<compile_context>
chip_gen: v7x
topology: tpu7x:2x2x1
jax: 0.10.0
libtpu: 0.0.40
codegen_flags: <defaults>
</compile_context>

<pallas_src>
import math
import jax
import jax.numpy as jnp
from jax.experimental import pallas as pl
from jax.experimental.pallas import tpu as pltpu

# ----------------------------- configuration -------------------------------
B = 2          # batch
N = 4          # n_channels
F = 4          # n_frequencies
T = 16         # n_times
D = 16         # embed_dim
N_BLOCKS = 2   # model.n_blocks
N_CLASSES = 3  # dataset.n_classes

T2 = 2 * T                       # lane-stacked complex width (real | imag), time axis
D2 = 2 * D                       # lane-stacked complex width, embed axis
R_SPAT = B * (N + 1)             # rows of the spatial embedding slab
R_TEMP = R_SPAT * (F + 1)        # rows of the temporal embedding slab (f-major)
LANE = 128                       # lane-dense output width
R_OUT = ((B + 7) // 8) * 8       # sublane-full output rows

_HI = jax.lax.Precision.HIGHEST


# ------------------------------ fused kernel --------------------------------
def _bwn_kernel(x_ref, few1_ref, feb1_ref, few2_ref, feb2_ref,
                slab0_ref, fpe_ref, spat0_ref,
                dtw_ref, dtb_ref, tmw_ref, tmb_ref,
                tdw_ref, tdb_ref, spw_ref, spb_ref,
                wcls_ref, bcls_ref,
                o_ref, temp_scr):
    f32 = jnp.float32
    x = x_ref[...]                                      # [B, F, N, 2T] (real|imag lanes)

    # ---- Res2DModule (real + imag processed together via lane-varying weights, VPU) ----
    # TODO(synk): Res2DModule definition was not provided; implemented as a 1x1-conv
    # (channel-mixing) residual block with ReLU, same semantics as before.
    w1 = few1_ref[...]   # [N_in, N_out, 2T]
    b1 = feb1_ref[...]   # [N_out, 2T]
    w2 = few2_ref[...]
    b2 = feb2_ref[...]

    def channel_mix(v, wv, bv):
        acc = jnp.broadcast_to(bv[None, None, :, :], (B, F, N, T2))
        for n_in in range(N):
            acc = acc + v[:, :, n_in:n_in + 1, :] * wv[n_in][None, None, :, :]
        return acc

    h = jnp.maximum(channel_mix(x, w1, b1), 0.0)
    y = jnp.maximum(channel_mix(h, w2, b2) + x, 0.0)    # [B, F, N, 2T]

    # ---- assemble temporal embedding slab (f-major rows) in VMEM scratch ----
    slab0 = slab0_ref[...]                              # [N+1, 2T]: zero CLS-channel row + (fct + fpe[0])
    fpe = fpe_ref[...]                                  # [F, 2T]:   fpe rows 1..F
    temp_scr[...] = jnp.zeros((R_TEMP, T2), f32)
    for bi in range(B):
        temp_scr[bi * (N + 1):(bi + 1) * (N + 1), :] = slab0
    for fi in range(F):
        fpe_f = fpe[fi:fi + 1, :]
        for bi in range(B):
            base = (fi + 1) * R_SPAT + bi * (N + 1) + 1
            temp_scr[base:base + N, :] = y[bi, fi] + fpe_f

    # ---- spatial embedding slab ----
    spat0 = spat0_ref[...]                              # [N+1, 2D] = [sct ; se]
    spat = jnp.concatenate([spat0] * B, axis=0)         # [R_SPAT, 2D]

    # ---- TS_Encoder blocks (stacked-complex matmuls: one MXU dot each) ----
    for blk in range(N_BLOCKS):
        w_dt = dtw_ref[blk]; b_dt = dtb_ref[blk]
        w_tm = tmw_ref[blk]; b_tm = tmb_ref[blk]
        w_td = tdw_ref[blk]; b_td = tdb_ref[blk]
        w_sp = spw_ref[blk]; b_sp = spb_ref[blk]

        # temp += pad(D_to_T(spat))  -> only the f == 0 rows are touched
        dt = jnp.dot(spat, w_dt, preferred_element_type=f32) + b_dt           # [R_SPAT, 2T]
        temp_scr[0:R_SPAT, :] = temp_scr[0:R_SPAT, :] + dt

        # TODO(synk): TemporalEnc definition not provided; residual complex linear.
        t_all = temp_scr[...]
        temp_scr[...] = t_all + (jnp.dot(t_all, w_tm, preferred_element_type=f32) + b_tm)

        # spat += T_to_D(temp[:, :, :1, :])
        td = jnp.dot(temp_scr[0:R_SPAT, :], w_td, preferred_element_type=f32) + b_td
        spat = spat + td

        # TODO(synk): SpatialEnc definition not provided; residual complex linear.
        spat = spat + (jnp.dot(spat, w_sp, preferred_element_type=f32) + b_sp)

    # ---- classifier head on the class token (b, n=0); lane-dense (8,128) output ----
    cls_rows = [spat[bi * (N + 1):bi * (N + 1) + 1, :] for bi in range(B)]
    if R_OUT > B:
        cls_rows.append(jnp.zeros((R_OUT - B, D2), f32))
    cls = jnp.concatenate(cls_rows, axis=0)                                   # [R_OUT, 2D]
    o_ref[...] = (jnp.dot(cls, wcls_ref[...], preferred_element_type=f32)
                  + bcls_ref[...])                                            # [R_OUT, 128]


# ------------------------------- wrapper -------------------------------------
def _full_spec(shape):
    return pl.BlockSpec(shape, lambda i: (0,) * len(shape))


def brainwavenet_forward(kp, features):
    """features: [B, T, F, N, 2] -> logits [B, n_classes] (single fused kernel)."""
    # Input prep (one small XLA fusion): permute to [B, F, N, T] and lane-stack
    # real|imag so everything downstream is channels-last with 2T lanes.
    fr = jnp.transpose(features[..., 0], (0, 2, 3, 1))   # [B, F, N, T]
    fi = jnp.transpose(features[..., 1], (0, 2, 3, 1))
    x_s = jnp.concatenate([fr, fi], axis=-1)             # [B, F, N, 2T]

    operands = (x_s, kp["few1"], kp["feb1"], kp["few2"], kp["feb2"],
                kp["slab0"], kp["fpe_rest"], kp["spat0"],
                kp["dt_w"], kp["dt_b"], kp["tm_w"], kp["tm_b"],
                kp["td_w"], kp["td_b"], kp["sp_w"], kp["sp_b"],
                kp["w_cls"], kp["b_cls"])

    logits_pad = pl.pallas_call(
        _bwn_kernel,
        out_shape=jax.ShapeDtypeStruct((R_OUT, LANE), jnp.float32),
        grid=(1,),
        in_specs=[_full_spec(op.shape) for op in operands],
        out_specs=_full_spec((R_OUT, LANE)),
        scratch_shapes=[pltpu.VMEM((R_TEMP, T2), jnp.float32)],
        compiler_params=pltpu.CompilerParams(
            dimension_semantics=("arbitrary",)),
    )(*operands)
    return logits_pad[:B, :N_CLASSES]


# --------------------------- parameter repacking ------------------------------
def prepare_params(p):
    """One-time repack of raw (PyTorch-style) parameters into kernel layout."""
    def lane_stack(real, imag):
        return jnp.concatenate([real, imag], axis=-1)

    # Res2D: lane-expanded channel-mix weights (real weights on lanes [0,T),
    # imag weights on lanes [T,2T)) -> wvec[n_in, n_out, 2T], bvec[n_out, 2T].
    def fe_pack(p_real, p_imag):
        w1r, b1r, w2r, b2r = p_real
        w1i, b1i, w2i, b2i = p_imag

        def wvec(wr, wi):
            return jnp.concatenate(
                [jnp.broadcast_to(wr[:, :, None], (N, N, T)),
                 jnp.broadcast_to(wi[:, :, None], (N, N, T))], axis=-1)

        def bvec(br, bi):
            return jnp.concatenate(
                [jnp.broadcast_to(br[:, None], (N, T)),
                 jnp.broadcast_to(bi[:, None], (N, T))], axis=-1)

        return wvec(w1r, w1i), bvec(b1r, b1i), wvec(w2r, w2i), bvec(b2r, b2i)

    few1, feb1, few2, feb2 = fe_pack(p["fe_real"], p["fe_imag"])

    # Stacked complex linear:  [xr | xi] @ [[Wr, Wi], [-Wi, Wr]] + [br | bi]
    def stack_cl(cl):
        wr, wi, br, bi = cl
        ws = jnp.concatenate(
            [jnp.concatenate([wr, wi], axis=1),
             jnp.concatenate([-wi, wr], axis=1)], axis=0)          # [2K, 2M]
        bs = jnp.concatenate([br, bi])[None, :]                    # [1, 2M]
        return ws, bs

    wav = p["wavelet"]
    dt = [stack_cl(blk["D_to_T"]) for blk in wav["blocks"]]
    tm = [stack_cl(blk["temporal"]) for blk in wav["blocks"]]
    td = [stack_cl(blk["T_to_D"]) for blk in wav["blocks"]]
    sp = [stack_cl(blk["spatial"]) for blk in wav["blocks"]]

    fct_s = lane_stack(wav["fct_real"][0, :, 0, :], wav["fct_imag"][0, :, 0, :])  # [N, 2T]
    fpe_s = lane_stack(wav["fpe_real"][0, 0], wav["fpe_imag"][0, 0])              # [F+1, 2T]
    slab0 = jnp.concatenate(
        [jnp.zeros((1, T2), jnp.float32), fct_s + fpe_s[0:1, :]], axis=0)         # [N+1, 2T]
    sct_s = lane_stack(wav["sct_real"][0, 0], wav["sct_imag"][0, 0])              # [1, 2D]
    se_s = lane_stack(wav["se_real"][0, :, 0, :], wav["se_imag"][0, :, 0, :])     # [N, 2D]
    spat0 = jnp.concatenate([sct_s, se_s], axis=0)                                # [N+1, 2D]

    # Classifier: reorder interleaved (r0,i0,r1,i1,...) weight rows into stacked
    # (r... | i...) order and pad the class dim to a full 128-lane tile.
    w_out = p["w_out"]
    wcls = jnp.concatenate([w_out[0::2, :], w_out[1::2, :]], axis=0)              # [2D, C]
    wcls = jnp.pad(wcls, ((0, 0), (0, LANE - N_CLASSES)))
    bcls = jnp.pad(p["b_out"][None, :], ((0, 0), (0, LANE - N_CLASSES)))

    return {
        "few1": few1, "feb1": feb1, "few2": few2, "feb2": feb2,
        "slab0": slab0, "fpe_rest": fpe_s[1:, :], "spat0": spat0,
        "dt_w": jnp.stack([w for w, _ in dt]), "dt_b": jnp.stack([b for _, b in dt]),
        "tm_w": jnp.stack([w for w, _ in tm]), "tm_b": jnp.stack([b for _, b in tm]),
        "td_w": jnp.stack([w for w, _ in td]), "td_b": jnp.stack([b for _, b in td]),
        "sp_w": jnp.stack([w for w, _ in sp]), "sp_b": jnp.stack([b for _, b in sp]),
        "w_cls": wcls, "b_cls": bcls,
    }


# --------------------------- pure-JAX reference -------------------------------
def reference_forward(params, features):
    """Plain-JAX reference with the same (placeholder) semantics, for checking."""
    relu = lambda v: jnp.maximum(v, 0.0)

    def res2d(x, p):                                    # x: [B, N, F, T]
        w1, b1, w2, b2 = p
        b_, n_, f_, t_ = x.shape
        x2 = jnp.transpose(x, (0, 2, 3, 1)).reshape(-1, n_)
        hh = relu(jnp.dot(x2, w1, precision=_HI) + b1)
        yy = relu(jnp.dot(hh, w2, precision=_HI) + b2 + x2)
        return jnp.transpose(yy.reshape(b_, f_, t_, n_), (0, 3, 1, 2))

    def clinear(xr, xi, cl):
        wr, wi, br, bi = cl
        rr = jnp.einsum("...k,kn->...n", xr, wr, precision=_HI)
        ii = jnp.einsum("...k,kn->...n", xi, wi, precision=_HI)
        ri = jnp.einsum("...k,kn->...n", xr, wi, precision=_HI)
        ir = jnp.einsum("...k,kn->...n", xi, wr, precision=_HI)
        return rr - ii + br, ri + ir + bi

    xr = jnp.transpose(features[..., 0], (0, 3, 2, 1))
    xi = jnp.transpose(features[..., 1], (0, 3, 2, 1))
    fe_r = res2d(xr, params["fe_real"])
    fe_i = res2d(xi, params["fe_imag"])

    p = params["wavelet"]
    batch = xr.shape[0]
    fct_r = jnp.broadcast_to(p["fct_real"], (batch, N, 1, T))
    fct_i = jnp.broadcast_to(p["fct_imag"], (batch, N, 1, T))
    temp_r = jnp.concatenate([fct_r, fe_r], axis=2) + p["fpe_real"]
    temp_i = jnp.concatenate([fct_i, fe_i], axis=2) + p["fpe_imag"]
    pad_cfg = ((0, 0), (1, 0), (0, 0), (0, 0))
    temp_r = jnp.pad(temp_r, pad_cfg)
    temp_i = jnp.pad(temp_i, pad_cfg)

    sct_r = jnp.broadcast_to(p["sct_real"], (batch, 1, 1, D))
    sct_i = jnp.broadcast_to(p["sct_imag"], (batch, 1, 1, D))
    se_r = jnp.broadcast_to(p["se_real"], (batch, N, 1, D))
    se_i = jnp.broadcast_to(p["se_imag"], (batch, N, 1, D))
    spat_r = jnp.concatenate([sct_r, se_r], axis=1)
    spat_i = jnp.concatenate([sct_i, se_i], axis=1)

    for blk in p["blocks"]:
        dt_r, dt_i = clinear(spat_r, spat_i, blk["D_to_T"])
        pad_f = ((0, 0), (0, 0), (0, F), (0, 0))
        temp_r = temp_r + jnp.pad(dt_r, pad_f)
        temp_i = temp_i + jnp.pad(dt_i, pad_f)
        tr, ti = clinear(temp_r, temp_i, blk["temporal"])
        temp_r = temp_r + tr
        temp_i = temp_i + ti
        td_r, td_i = clinear(temp_r[:, :, :1, :], temp_i[:, :, :1, :], blk["T_to_D"])
        spat_r = spat_r + td_r
        spat_i = spat_i + td_i
        sr, si = clinear(spat_r, spat_i, blk["spatial"])
        spat_r = spat_r + sr
        spat_i = spat_i + si

    out = jnp.stack([spat_r[:, 0, 0, :], spat_i[:, 0, 0, :]], axis=-1)
    out = out.reshape(out.shape[0], -1)
    return jnp.dot(out, params["w_out"], precision=_HI) + params["b_out"]


# ------------------------------ parameter init -------------------------------
def _uniform(key, shape, scale):
    return jax.random.uniform(key, shape, jnp.float32, -scale, scale)


def init_complex_linear(key, in_dim, out_dim):
    ks = jax.random.split(key, 4)
    s = 1.0 / math.sqrt(in_dim)
    # stored as [in, out] (already transposed for x @ W)
    return (_uniform(ks[0], (in_dim, out_dim), s),
            _uniform(ks[1], (in_dim, out_dim), s),
            _uniform(ks[2], (out_dim,), s),
            _uniform(ks[3], (out_dim,), s))


def init_params(key):
    keys = jax.random.split(key, 16)
    s_n = 1.0 / math.sqrt(N)

    def fe_params(k):
        kk = jax.random.split(k, 4)
        return (_uniform(kk[0], (N, N), s_n), _uniform(kk[1], (N,), s_n),
                _uniform(kk[2], (N, N), s_n), _uniform(kk[3], (N,), s_n))

    blocks = []
    blk_keys = jax.random.split(keys[2], N_BLOCKS)
    for bk in blk_keys:
        k1, k2, k3, k4 = jax.random.split(bk, 4)
        blocks.append({
            "D_to_T": init_complex_linear(k1, D, T),
            "T_to_D": init_complex_linear(k2, T, D),
            "temporal": init_complex_linear(k3, T, T),
            "spatial": init_complex_linear(k4, D, D),
        })

    wavelet = {
        "fct_real": jnp.zeros((1, N, 1, T), jnp.float32),
        "fct_imag": jnp.zeros((1, N, 1, T), jnp.float32),
        "fpe_real": jnp.zeros((1, 1, F + 1, T), jnp.float32),
        "fpe_imag": jnp.zeros((1, 1, F + 1, T), jnp.float32),
        "sct_real": jnp.zeros((1, 1, 1, D), jnp.float32),
        "sct_imag": jnp.zeros((1, 1, 1, D), jnp.float32),
        "se_real": jax.random.uniform(keys[3], (1, N, 1, D), jnp.float32),
        "se_imag": jax.random.uniform(keys[4], (1, N, 1, D), jnp.float32),
        "blocks": blocks,
    }

    s_out = 1.0 / math.sqrt(2 * D)
    return {
        "fe_real": fe_params(keys[0]),
        "fe_imag": fe_params(keys[1]),
        "wavelet": wavelet,
        "w_out": _uniform(keys[5], (2 * D, N_CLASSES), s_out),
        "b_out": _uniform(keys[6], (N_CLASSES,), s_out),
    }


# ----------------------------------- main ------------------------------------
if __name__ == "__main__":
    root = jax.random.PRNGKey(0)
    k_param, k_feat = jax.random.split(root)
    params = init_params(k_param)
    features = jax.random.normal(k_feat, (B, T, F, N, 2), jnp.float32)

    kparams = prepare_params(params)          # one-time repack, not per forward
    fwd = jax.jit(brainwavenet_forward)
    logits = fwd(kparams, features)
    jax.block_until_ready(logits)

    ref = jax.jit(reference_forward)(params, features)
    jax.block_until_ready(ref)

    assert logits.shape == (B, N_CLASSES)
    assert bool(jnp.all(jnp.isfinite(logits)))
    assert bool(jnp.allclose(logits, ref, rtol=1e-2, atol=1e-2)), (
        "kernel/reference mismatch: "
        f"max abs diff = {float(jnp.max(jnp.abs(logits - ref)))}")
    print("KERNEL_OK")
</pallas_src>

<mosaic_0001>
module attributes {stable_mosaic.version = 11 : i64} {
  func.func @_bwn_kernel(%arg0: i32, %arg1: memref<2x4x4x32xf32, #tpu.memory_space<vmem>>, %arg2: memref<4x4x32xf32, #tpu.memory_space<vmem>>, %arg3: memref<4x32xf32, #tpu.memory_space<vmem>>, %arg4: memref<4x4x32xf32, #tpu.memory_space<vmem>>, %arg5: memref<4x32xf32, #tpu.memory_space<vmem>>, %arg6: memref<5x32xf32, #tpu.memory_space<vmem>>, %arg7: memref<4x32xf32, #tpu.memory_space<vmem>>, %arg8: memref<5x32xf32, #tpu.memory_space<vmem>>, %arg9: memref<2x32x32xf32, #tpu.memory_space<vmem>>, %arg10: memref<2x1x32xf32, #tpu.memory_space<vmem>>, %arg11: memref<2x32x32xf32, #tpu.memory_space<vmem>>, %arg12: memref<2x1x32xf32, #tpu.memory_space<vmem>>, %arg13: memref<2x32x32xf32, #tpu.memory_space<vmem>>, %arg14: memref<2x1x32xf32, #tpu.memory_space<vmem>>, %arg15: memref<2x32x32xf32, #tpu.memory_space<vmem>>, %arg16: memref<2x1x32xf32, #tpu.memory_space<vmem>>, %arg17: memref<32x128xf32, #tpu.memory_space<vmem>>, %arg18: memref<1x128xf32, #tpu.memory_space<vmem>>, %arg19: memref<8x128xf32, #tpu.memory_space<vmem>>, %arg20: memref<50x32xf32, #tpu.memory_space<vmem>>) attributes {dimension_semantics = [#tpu.dimension_semantics<arbitrary>], iteration_bounds = array<i64: 1>, scalar_prefetch = 0 : i64, scratch_operands = 1 : i64, tpu.core_type = #tpu.core_type<tc>, window_params = [{pipeline_mode = #tpu.pipeline_mode<synchronous>, transform_indices = @transform_0, window_bounds = array<i64: 2, 4, 4, 32>}, {pipeline_mode = #tpu.pipeline_mode<synchronous>, transform_indices = @transform_1, window_bounds = array<i64: 4, 4, 32>}, {pipeline_mode = #tpu.pipeline_mode<synchronous>, transform_indices = @transform_2, window_bounds = array<i64: 4, 32>}, {pipeline_mode = #tpu.pipeline_mode<synchronous>, transform_indices = @transform_3, window_bounds = array<i64: 4, 4, 32>}, {pipeline_mode = #tpu.pipeline_mode<synchronous>, transform_indices = @transform_4, window_bounds = array<i64: 4, 32>}, {pipeline_mode = #tpu.pipeline_mode<synchronous>, transform_indices = @transform_5, window_bounds = array<i64: 5, 32>}, {pipeline_mode = #tpu.pipeline_mode<synchronous>, transform_indices = @transform_6, window_bounds = array<i64: 4, 32>}, {pipeline_mode = #tpu.pipeline_mode<synchronous>, transform_indices = @transform_7, window_bounds = array<i64: 5, 32>}, {pipeline_mode = #tpu.pipeline_mode<synchronous>, transform_indices = @transform_8, window_bounds = array<i64: 2, 32, 32>}, {pipeline_mode = #tpu.pipeline_mode<synchronous>, transform_indices = @transform_9, window_bounds = array<i64: 2, 1, 32>}, {pipeline_mode = #tpu.pipeline_mode<synchronous>, transform_indices = @transform_10, window_bounds = array<i64: 2, 32, 32>}, {pipeline_mode = #tpu.pipeline_mode<synchronous>, transform_indices = @transform_11, window_bounds = array<i64: 2, 1, 32>}, {pipeline_mode = #tpu.pipeline_mode<synchronous>, transform_indices = @transform_12, window_bounds = array<i64: 2, 32, 32>}, {pipeline_mode = #tpu.pipeline_mode<synchronous>, transform_indices = @transform_13, window_bounds = array<i64: 2, 1, 32>}, {pipeline_mode = #tpu.pipeline_mode<synchronous>, transform_indices = @transform_14, window_bounds = array<i64: 2, 32, 32>}, {pipeline_mode = #tpu.pipeline_mode<synchronous>, transform_indices = @transform_15, window_bounds = array<i64: 2, 1, 32>}, {pipeline_mode = #tpu.pipeline_mode<synchronous>, transform_indices = @transform_16, window_bounds = array<i64: 32, 128>}, {pipeline_mode = #tpu.pipeline_mode<synchronous>, transform_indices = @transform_17, window_bounds = array<i64: 1, 128>}, {pipeline_mode = #tpu.pipeline_mode<synchronous>, transform_indices = @transform_18, window_bounds = array<i64: 8, 128>}]} {
    %c0 = arith.constant 0 : index
    %c0_0 = arith.constant 0 : index
    %c0_1 = arith.constant 0 : index
    %c0_2 = arith.constant 0 : index
    %0 = vector.load %arg1[%c0, %c0_0, %c0_1, %c0_2] : memref<2x4x4x32xf32, #tpu.memory_space<vmem>>, vector<2x4x4x32xf32>
    %c0_3 = arith.constant 0 : index
    %c0_4 = arith.constant 0 : index
    %c0_5 = arith.constant 0 : index
    %1 = vector.load %arg2[%c0_3, %c0_4, %c0_5] : memref<4x4x32xf32, #tpu.memory_space<vmem>>, vector<4x4x32xf32>
    %c0_6 = arith.constant 0 : index
    %c0_7 = arith.constant 0 : index
    %2 = vector.load %arg3[%c0_6, %c0_7] : memref<4x32xf32, #tpu.memory_space<vmem>>, vector<4x32xf32>
    %c0_8 = arith.constant 0 : index
    %c0_9 = arith.constant 0 : index
    %c0_10 = arith.constant 0 : index
    %3 = vector.load %arg4[%c0_8, %c0_9, %c0_10] : memref<4x4x32xf32, #tpu.memory_space<vmem>>, vector<4x4x32xf32>
    %c0_11 = arith.constant 0 : index
    %c0_12 = arith.constant 0 : index
    %4 = vector.load %arg5[%c0_11, %c0_12] : memref<4x32xf32, #tpu.memory_space<vmem>>, vector<4x32xf32>
    %5 = vector.shape_cast %2 : vector<4x32xf32> to vector<1x1x4x32xf32>
    %6 = vector.shape_cast %5 : vector<1x1x4x32xf32> to vector<1x1x4x32xf32>
    %7 = vector.broadcast %6 : vector<1x1x4x32xf32> to vector<2x4x4x32xf32>
    %8 = vector.extract_strided_slice %0 {offsets = [0, 0, 0, 0], sizes = [2, 4, 1, 32], strides = [1, 1, 1, 1]} : vector<2x4x4x32xf32> to vector<2x4x1x32xf32>
    %9 = vector.extract_strided_slice %1 {offsets = [0, 0, 0], sizes = [1, 4, 32], strides = [1, 1, 1]} : vector<4x4x32xf32> to vector<1x4x32xf32>
    %10 = vector.shape_cast %9 : vector<1x4x32xf32> to vector<4x32xf32>
    %11 = vector.shape_cast %10 : vector<4x32xf32> to vector<1x1x4x32xf32>
    %12 = vector.broadcast %8 : vector<2x4x1x32xf32> to vector<2x4x4x32xf32>
    %13 = vector.broadcast %11 : vector<1x1x4x32xf32> to vector<2x4x4x32xf32>
    %14 = arith.mulf %12, %13 : vector<2x4x4x32xf32>
    %15 = arith.addf %7, %14 : vector<2x4x4x32xf32>
    %16 = vector.extract_strided_slice %0 {offsets = [0, 0, 1, 0], sizes = [2, 4, 1, 32], strides = [1, 1, 1, 1]} : vector<2x4x4x32xf32> to vector<2x4x1x32xf32>
    %17 = vector.extract_strided_slice %1 {offsets = [1, 0, 0], sizes = [1, 4, 32], strides = [1, 1, 1]} : vector<4x4x32xf32> to vector<1x4x32xf32>
    %18 = vector.shape_cast %17 : vector<1x4x32xf32> to vector<4x32xf32>
    %19 = vector.shape_cast %18 : vector<4x32xf32> to vector<1x1x4x32xf32>
    %20 = vector.broadcast %16 : vector<2x4x1x32xf32> to vector<2x4x4x32xf32>
    %21 = vector.broadcast %19 : vector<1x1x4x32xf32> to vector<2x4x4x32xf32>
    %22 = arith.mulf %20, %21 : vector<2x4x4x32xf32>
    %23 = arith.addf %15, %22 : vector<2x4x4x32xf32>
    %24 = vector.extract_strided_slice %0 {offsets = [0, 0, 2, 0], sizes = [2, 4, 1, 32], strides = [1, 1, 1, 1]} : vector<2x4x4x32xf32> to vector<2x4x1x32xf32>
    %25 = vector.extract_strided_slice %1 {offsets = [2, 0, 0], sizes = [1, 4, 32], strides = [1, 1, 1]} : vector<4x4x32xf32> to vector<1x4x32xf32>
    %26 = vector.shape_cast %25 : vector<1x4x32xf32> to vector<4x32xf32>
    %27 = vector.shape_cast %26 : vector<4x32xf32> to vector<1x1x4x32xf32>
    %28 = vector.broadcast %24 : vector<2x4x1x32xf32> to vector<2x4x4x32xf32>
    %29 = vector.broadcast %27 : vector<1x1x4x32xf32> to vector<2x4x4x32xf32>
    %30 = arith.mulf %28, %29 : vector<2x4x4x32xf32>
    %31 = arith.addf %23, %30 : vector<2x4x4x32xf32>
    %32 = vector.extract_strided_slice %0 {offsets = [0, 0, 3, 0], sizes = [2, 4, 1, 32], strides = [1, 1, 1, 1]} : vector<2x4x4x32xf32> to vector<2x4x1x32xf32>
    %33 = vector.extract_strided_slice %1 {offsets = [3, 0, 0], sizes = [1, 4, 32], strides = [1, 1, 1]} : vector<4x4x32xf32> to vector<1x4x32xf32>
    %34 = vector.shape_cast %33 : vector<1x4x32xf32> to vector<4x32xf32>
    %35 = vector.shape_cast %34 : vector<4x32xf32> to vector<1x1x4x32xf32>
    %36 = vector.broadcast %32 : vector<2x4x1x32xf32> to vector<2x4x4x32xf32>
    %37 = vector.broadcast %35 : vector<1x1x4x32xf32> to vector<2x4x4x32xf32>
    %38 = arith.mulf %36, %37 : vector<2x4x4x32xf32>
    %39 = arith.addf %31, %38 : vector<2x4x4x32xf32>
    %cst = arith.constant 0.000000e+00 : f32
    %40 = vector.broadcast %cst : f32 to vector<2x4x4x32xf32>
    %41 = arith.maximumf %39, %40 : vector<2x4x4x32xf32>
    %42 = vector.shape_cast %4 : vector<4x32xf32> to vector<1x1x4x32xf32>
    %43 = vector.shape_cast %42 : vector<1x1x4x32xf32> to vector<1x1x4x32xf32>
    %44 = vector.broadcast %43 : vector<1x1x4x32xf32> to vector<2x4x4x32xf32>
    %45 = vector.extract_strided_slice %41 {offsets = [0, 0, 0, 0], sizes = [2, 4, 1, 32], strides = [1, 1, 1, 1]} : vector<2x4x4x32xf32> to vector<2x4x1x32xf32>
    %46 = vector.extract_strided_slice %3 {offsets = [0, 0, 0], sizes = [1, 4, 32], strides = [1, 1, 1]} : vector<4x4x32xf32> to vector<1x4x32xf32>
    %47 = vector.shape_cast %46 : vector<1x4x32xf32> to vector<4x32xf32>
    %48 = vector.shape_cast %47 : vector<4x32xf32> to vector<1x1x4x32xf32>
    %49 = vector.broadcast %45 : vector<2x4x1x32xf32> to vector<2x4x4x32xf32>
    %50 = vector.broadcast %48 : vector<1x1x4x32xf32> to vector<2x4x4x32xf32>
    %51 = arith.mulf %49, %50 : vector<2x4x4x32xf32>
    %52 = arith.addf %44, %51 : vector<2x4x4x32xf32>
    %53 = vector.extract_strided_slice %41 {offsets = [0, 0, 1, 0], sizes = [2, 4, 1, 32], strides = [1, 1, 1, 1]} : vector<2x4x4x32xf32> to vector<2x4x1x32xf32>
    %54 = vector.extract_strided_slice %3 {offsets = [1, 0, 0], sizes = [1, 4, 32], strides = [1, 1, 1]} : vector<4x4x32xf32> to vector<1x4x32xf32>
    %55 = vector.shape_cast %54 : vector<1x4x32xf32> to vector<4x32xf32>
    %56 = vector.shape_cast %55 : vector<4x32xf32> to vector<1x1x4x32xf32>
    %57 = vector.broadcast %53 : vector<2x4x1x32xf32> to vector<2x4x4x32xf32>
    %58 = vector.broadcast %56 : vector<1x1x4x32xf32> to vector<2x4x4x32xf32>
    %59 = arith.mulf %57, %58 : vector<2x4x4x32xf32>
    %60 = arith.addf %52, %59 : vector<2x4x4x32xf32>
    %61 = vector.extract_strided_slice %41 {offsets = [0, 0, 2, 0], sizes = [2, 4, 1, 32], strides = [1, 1, 1, 1]} : vector<2x4x4x32xf32> to vector<2x4x1x32xf32>
    %62 = vector.extract_strided_slice %3 {offsets = [2, 0, 0], sizes = [1, 4, 32], strides = [1, 1, 1]} : vector<4x4x32xf32> to vector<1x4x32xf32>
    %63 = vector.shape_cast %62 : vector<1x4x32xf32> to vector<4x32xf32>
    %64 = vector.shape_cast %63 : vector<4x32xf32> to vector<1x1x4x32xf32>
    %65 = vector.broadcast %61 : vector<2x4x1x32xf32> to vector<2x4x4x32xf32>
    %66 = vector.broadcast %64 : vector<1x1x4x32xf32> to vector<2x4x4x32xf32>
    %67 = arith.mulf %65, %66 : vector<2x4x4x32xf32>
    %68 = arith.addf %60, %67 : vector<2x4x4x32xf32>
    %69 = vector.extract_strided_slice %41 {offsets = [0, 0, 3, 0], sizes = [2, 4, 1, 32], strides = [1, 1, 1, 1]} : vector<2x4x4x32xf32> to vector<2x4x1x32xf32>
    %70 = vector.extract_strided_slice %3 {offsets = [3, 0, 0], sizes = [1, 4, 32], strides = [1, 1, 1]} : vector<4x4x32xf32> to vector<1x4x32xf32>
    %71 = vector.shape_cast %70 : vector<1x4x32xf32> to vector<4x32xf32>
    %72 = vector.shape_cast %71 : vector<4x32xf32> to vector<1x1x4x32xf32>
    %73 = vector.broadcast %69 : vector<2x4x1x32xf32> to vector<2x4x4x32xf32>
    %74 = vector.broadcast %72 : vector<1x1x4x32xf32> to vector<2x4x4x32xf32>
    %75 = arith.mulf %73, %74 : vector<2x4x4x32xf32>
    %76 = arith.addf %68, %75 : vector<2x4x4x32xf32>
    %77 = arith.addf %76, %0 : vector<2x4x4x32xf32>
    %cst_13 = arith.constant 0.000000e+00 : f32
    %78 = vector.broadcast %cst_13 : f32 to vector<2x4x4x32xf32>
    %79 = arith.maximumf %77, %78 : vector<2x4x4x32xf32>
    %c0_14 = arith.constant 0 : index
    %c0_15 = arith.constant 0 : index
    %80 = vector.load %arg6[%c0_14, %c0_15] : memref<5x32xf32, #tpu.memory_space<vmem>>, vector<5x32xf32>
    %c0_16 = arith.constant 0 : index
    %c0_17 = arith.constant 0 : index
    %81 = vector.load %arg7[%c0_16, %c0_17] : memref<4x32xf32, #tpu.memory_space<vmem>>, vector<4x32xf32>
    %cst_18 = arith.constant 0.000000e+00 : f32
    %82 = vector.broadcast %cst_18 : f32 to vector<50x32xf32>
    %c0_19 = arith.constant 0 : index
    %c0_20 = arith.constant 0 : index
    %83 = vector.load %arg20[%c0_19, %c0_20] : memref<50x32xf32, #tpu.memory_space<vmem>>, vector<50x32xf32>
    tpu.vector_store %arg20[%c0_19, %c0_20], %82 {strides = array<i32>} : memref<50x32xf32, #tpu.memory_space<vmem>>, vector<50x32xf32>,
    %c0_21 = arith.constant 0 : index
    %c0_22 = arith.constant 0 : index
    %84 = vector.load %arg20[%c0_21, %c0_22] : memref<50x32xf32, #tpu.memory_space<vmem>>, vector<5x32xf32>
    tpu.vector_store %arg20[%c0_21, %c0_22], %80 {strides = array<i32>} : memref<50x32xf32, #tpu.memory_space<vmem>>, vector<5x32xf32>,
    %c5 = arith.constant 5 : index
    %c0_23 = arith.constant 0 : index
    %85 = vector.load %arg20[%c5, %c0_23] : memref<50x32xf32, #tpu.memory_space<vmem>>, vector<5x32xf32>
    tpu.vector_store %arg20[%c5, %c0_23], %80 {strides = array<i32>} : memref<50x32xf32, #tpu.memory_space<vmem>>, vector<5x32xf32>,
    %86 = vector.extract_strided_slice %81 {offsets = [0, 0], sizes = [1, 32], strides = [1, 1]} : vector<4x32xf32> to vector<1x32xf32>
    %87 = vector.extract_strided_slice %79 {offsets = [0, 0, 0, 0], sizes = [1, 1, 4, 32], strides = [1, 1, 1, 1]} : vector<2x4x4x32xf32> to vector<1x1x4x32xf32>
    %88 = vector.shape_cast %87 : vector<1x1x4x32xf32> to vector<4x32xf32>
    %89 = vector.broadcast %86 : vector<1x32xf32> to vector<4x32xf32>
    %90 = arith.addf %88, %89 : vector<4x32xf32>
    %c11 = arith.constant 11 : index
    %c0_24 = arith.constant 0 : index
    %91 = vector.load %arg20[%c11, %c0_24] : memref<50x32xf32, #tpu.memory_space<vmem>>, vector<4x32xf32>
    tpu.vector_store %arg20[%c11, %c0_24], %90 {strides = array<i32>} : memref<50x32xf32, #tpu.memory_space<vmem>>, vector<4x32xf32>,
    %92 = vector.extract_strided_slice %79 {offsets = [1, 0, 0, 0], sizes = [1, 1, 4, 32], strides = [1, 1, 1, 1]} : vector<2x4x4x32xf32> to vector<1x1x4x32xf32>
    %93 = vector.shape_cast %92 : vector<1x1x4x32xf32> to vector<4x32xf32>
    %94 = vector.broadcast %86 : vector<1x32xf32> to vector<4x32xf32>
    %95 = arith.addf %93, %94 : vector<4x32xf32>
    %c16 = arith.constant 16 : index
    %c0_25 = arith.constant 0 : index
    %96 = vector.load %arg20[%c16, %c0_25] : memref<50x32xf32, #tpu.memory_space<vmem>>, vector<4x32xf32>
    tpu.vector_store %arg20[%c16, %c0_25], %95 {strides = array<i32>} : memref<50x32xf32, #tpu.memory_space<vmem>>, vector<4x32xf32>,
    %97 = vector.extract_strided_slice %81 {offsets = [1, 0], sizes = [1, 32], strides = [1, 1]} : vector<4x32xf32> to vector<1x32xf32>
    %98 = vector.extract_strided_slice %79 {offsets = [0, 1, 0, 0], sizes = [1, 1, 4, 32], strides = [1, 1, 1, 1]} : vector<2x4x4x32xf32> to vector<1x1x4x32xf32>
    %99 = vector.shape_cast %98 : vector<1x1x4x32xf32> to vector<4x32xf32>
    %100 = vector.broadcast %97 : vector<1x32xf32> to vector<4x32xf32>
    %101 = arith.addf %99, %100 : vector<4x32xf32>
    %c21 = arith.constant 21 : index
    %c0_26 = arith.constant 0 : index
    %102 = vector.load %arg20[%c21, %c0_26] : memref<50x32xf32, #tpu.memory_space<vmem>>, vector<4x32xf32>
    tpu.vector_store %arg20[%c21, %c0_26], %101 {strides = array<i32>} : memref<50x32xf32, #tpu.memory_space<vmem>>, vector<4x32xf32>,
    %103 = vector.extract_strided_slice %79 {offsets = [1, 1, 0, 0], sizes = [1, 1, 4, 32], strides = [1, 1, 1, 1]} : vector<2x4x4x32xf32> to vector<1x1x4x32xf32>
    %104 = vector.shape_cast %103 : vector<1x1x4x32xf32> to vector<4x32xf32>
    %105 = vector.broadcast %97 : vector<1x32xf32> to vector<4x32xf32>
    %106 = arith.addf %104, %105 : vector<4x32xf32>
    %c26 = arith.constant 26 : index
    %c0_27 = arith.constant 0 : index
    %107 = vector.load %arg20[%c26, %c0_27] : memref<50x32xf32, #tpu.memory_space<vmem>>, vector<4x32xf32>
    tpu.vector_store %arg20[%c26, %c0_27], %106 {strides = array<i32>} : memref<50x32xf32, #tpu.memory_space<vmem>>, vector<4x32xf32>,
    %108 = vector.extract_strided_slice %81 {offsets = [2, 0], sizes = [1, 32], strides = [1, 1]} : vector<4x32xf32> to vector<1x32xf32>
    %109 = vector.extract_strided_slice %79 {offsets = [0, 2, 0, 0], sizes = [1, 1, 4, 32], strides = [1, 1, 1, 1]} : vector<2x4x4x32xf32> to vector<1x1x4x32xf32>
    %110 = vector.shape_cast %109 : vector<1x1x4x32xf32> to vector<4x32xf32>
    %111 = vector.broadcast %108 : vector<1x32xf32> to vector<4x32xf32>
    %112 = arith.addf %110, %111 : vector<4x32xf32>
    %c31 = arith.constant 31 : index
    %c0_28 = arith.constant 0 : index
    %113 = vector.load %arg20[%c31, %c0_28] : memref<50x32xf32, #tpu.memory_space<vmem>>, vector<4x32xf32>
    tpu.vector_store %arg20[%c31, %c0_28], %112 {strides = array<i32>} : memref<50x32xf32, #tpu.memory_space<vmem>>, vector<4x32xf32>,
    %114 = vector.extract_strided_slice %79 {offsets = [1, 2, 0, 0], sizes = [1, 1, 4, 32], strides = [1, 1, 1, 1]} : vector<2x4x4x32xf32> to vector<1x1x4x32xf32>
    %115 = vector.shape_cast %114 : vector<1x1x4x32xf32> to vector<4x32xf32>
    %116 = vector.broadcast %108 : vector<1x32xf32> to vector<4x32xf32>
    %117 = arith.addf %115, %116 : vector<4x32xf32>
    %c36 = arith.constant 36 : index
    %c0_29 = arith.constant 0 : index
    %118 = vector.load %arg20[%c36, %c0_29] : memref<50x32xf32, #tpu.memory_space<vmem>>, vector<4x32xf32>
    tpu.vector_store %arg20[%c36, %c0_29], %117 {strides = array<i32>} : memref<50x32xf32, #tpu.memory_space<vmem>>, vector<4x32xf32>,
    %119 = vector.extract_strided_slice %81 {offsets = [3, 0], sizes = [1, 32], strides = [1, 1]} : vector<4x32xf32> to vector<1x32xf32>
    %120 = vector.extract_strided_slice %79 {offsets = [0, 3, 0, 0], sizes = [1, 1, 4, 32], strides = [1, 1, 1, 1]} : vector<2x4x4x32xf32> to vector<1x1x4x32xf32>
    %121 = vector.shape_cast %120 : vector<1x1x4x32xf32> to vector<4x32xf32>
    %122 = vector.broadcast %119 : vector<1x32xf32> to vector<4x32xf32>
    %123 = arith.addf %121, %122 : vector<4x32xf32>
    %c41 = arith.constant 41 : index
    %c0_30 = arith.constant 0 : index
    %124 = vector.load %arg20[%c41, %c0_30] : memref<50x32xf32, #tpu.memory_space<vmem>>, vector<4x32xf32>
    tpu.vector_store %arg20[%c41, %c0_30], %123 {strides = array<i32>} : memref<50x32xf32, #tpu.memory_space<vmem>>, vector<4x32xf32>,
    %125 = vector.extract_strided_slice %79 {offsets = [1, 3, 0, 0], sizes = [1, 1, 4, 32], strides = [1, 1, 1, 1]} : vector<2x4x4x32xf32> to vector<1x1x4x32xf32>
    %126 = vector.shape_cast %125 : vector<1x1x4x32xf32> to vector<4x32xf32>
    %127 = vector.broadcast %119 : vector<1x32xf32> to vector<4x32xf32>
    %128 = arith.addf %126, %127 : vector<4x32xf32>
    %c46 = arith.constant 46 : index
    %c0_31 = arith.constant 0 : index
    %129 = vector.load %arg20[%c46, %c0_31] : memref<50x32xf32, #tpu.memory_space<vmem>>, vector<4x32xf32>
    tpu.vector_store %arg20[%c46, %c0_31], %128 {strides = array<i32>} : memref<50x32xf32, #tpu.memory_space<vmem>>, vector<4x32xf32>,
    %c0_32 = arith.constant 0 : index
    %c0_33 = arith.constant 0 : index
    %130 = vector.load %arg8[%c0_32, %c0_33] : memref<5x32xf32, #tpu.memory_space<vmem>>, vector<5x32xf32>
    %131 = tpu.concatenate %130, %130 in 0 : vector<5x32xf32>, vector<5x32xf32> -> vector<10x32xf32>
    %c0_34 = arith.constant 0 : index
    %c0_35 = arith.constant 0 : index
    %c0_36 = arith.constant 0 : index
    %132 = vector.load %arg9[%c0_34, %c0_35, %c0_36] : memref<2x32x32xf32, #tpu.memory_space<vmem>>, vector<1x32x32xf32>
    %133 = vector.shape_cast %132 : vector<1x32x32xf32> to vector<32x32xf32>
    %c0_37 = arith.constant 0 : index
    %c0_38 = arith.constant 0 : index
    %c0_39 = arith.constant 0 : index
    %134 = vector.load %arg10[%c0_37, %c0_38, %c0_39] : memref<2x1x32xf32, #tpu.memory_space<vmem>>, vector<1x1x32xf32>
    %135 = vector.shape_cast %134 : vector<1x1x32xf32> to vector<1x32xf32>
    %c0_40 = arith.constant 0 : index
    %c0_41 = arith.constant 0 : index
    %c0_42 = arith.constant 0 : index
    %136 = vector.load %arg11[%c0_40, %c0_41, %c0_42] : memref<2x32x32xf32, #tpu.memory_space<vmem>>, vector<1x32x32xf32>
    %137 = vector.shape_cast %136 : vector<1x32x32xf32> to vector<32x32xf32>
    %c0_43 = arith.constant 0 : index
    %c0_44 = arith.constant 0 : index
    %c0_45 = arith.constant 0 : index
    %138 = vector.load %arg12[%c0_43, %c0_44, %c0_45] : memref<2x1x32xf32, #tpu.memory_space<vmem>>, vector<1x1x32xf32>
    %139 = vector.shape_cast %138 : vector<1x1x32xf32> to vector<1x32xf32>
    %c0_46 = arith.constant 0 : index
    %c0_47 = arith.constant 0 : index
    %c0_48 = arith.constant 0 : index
    %140 = vector.load %arg13[%c0_46, %c0_47, %c0_48] : memref<2x32x32xf32, #tpu.memory_space<vmem>>, vector<1x32x32xf32>
    %141 = vector.shape_cast %140 : vector<1x32x32xf32> to vector<32x32xf32>
    %c0_49 = arith.constant 0 : index
    %c0_50 = arith.constant 0 : index
    %c0_51 = arith.constant 0 : index
    %142 = vector.load %arg14[%c0_49, %c0_50, %c0_51] : memref<2x1x32xf32, #tpu.memory_space<vmem>>, vector<1x1x32xf32>
    %143 = vector.shape_cast %142 : vector<1x1x32xf32> to vector<1x32xf32>
    %c0_52 = arith.constant 0 : index
    %c0_53 = arith.constant 0 : index
    %c0_54 = arith.constant 0 : index
    %144 = vector.load %arg15[%c0_52, %c0_53, %c0_54] : memref<2x32x32xf32, #tpu.memory_space<vmem>>, vector<1x32x32xf32>
    %145 = vector.shape_cast %144 : vector<1x32x32xf32> to vector<32x32xf32>
    %c0_55 = arith.constant 0 : index
    %c0_56 = arith.constant 0 : index
    %c0_57 = arith.constant 0 : index
    %146 = vector.load %arg16[%c0_55, %c0_56, %c0_57] : memref<2x1x32xf32, #tpu.memory_space<vmem>>, vector<1x1x32xf32>
    %147 = vector.shape_cast %146 : vector<1x1x32xf32> to vector<1x32xf32>
    %cst_58 = arith.constant dense<0.000000e+00> : vector<10x32xf32>
    %148 = tpu.matmul %131, %133, %cst_58 {dimension_numbers = #tpu.dot_dimension_numbers<[1], [0], [0], [1], [0, 0, 1, 1], [], []>} : vector<10x32xf32>, vector<32x32xf32>, vector<10x32xf32> -> vector<10x32xf32>
    %149 = vector.broadcast %135 : vector<1x32xf32> to vector<10x32xf32>
    %150 = arith.addf %148, %149 : vector<10x32xf32>
    %c0_59 = arith.constant 0 : index
    %c0_60 = arith.constant 0 : index
    %151 = vector.load %arg20[%c0_59, %c0_60] : memref<50x32xf32, #tpu.memory_space<vmem>>, vector<10x32xf32>
    %152 = arith.addf %151, %150 : vector<10x32xf32>
    %c0_61 = arith.constant 0 : index
    %c0_62 = arith.constant 0 : index
    %153 = vector.load %arg20[%c0_61, %c0_62] : memref<50x32xf32, #tpu.memory_space<vmem>>, vector<10x32xf32>
    tpu.vector_store %arg20[%c0_61, %c0_62], %152 {strides = array<i32>} : memref<50x32xf32, #tpu.memory_space<vmem>>, vector<10x32xf32>,
    %c0_63 = arith.constant 0 : index
    %c0_64 = arith.constant 0 : index
    %154 = vector.load %arg20[%c0_63, %c0_64] : memref<50x32xf32, #tpu.memory_space<vmem>>, vector<50x32xf32>
    %cst_65 = arith.constant dense<0.000000e+00> : vector<50x32xf32>
    %155 = tpu.matmul %154, %137, %cst_65 {dimension_numbers = #tpu.dot_dimension_numbers<[1], [0], [0], [1], [0, 0, 1, 1], [], []>} : vector<50x32xf32>, vector<32x32xf32>, vector<50x32xf32> -> vector<50x32xf32>
    %156 = vector.broadcast %139 : vector<1x32xf32> to vector<50x32xf32>
    %157 = arith.addf %155, %156 : vector<50x32xf32>
    %158 = arith.addf %154, %157 : vector<50x32xf32>
    %c0_66 = arith.constant 0 : index
    %c0_67 = arith.constant 0 : index
    %159 = vector.load %arg20[%c0_66, %c0_67] : memref<50x32xf32, #tpu.memory_space<vmem>>, vector<50x32xf32>
    tpu.vector_store %arg20[%c0_66, %c0_67], %158 {strides = array<i32>} : memref<50x32xf32, #tpu.memory_space<vmem>>, vector<50x32xf32>,
    %c0_68 = arith.constant 0 : index
    %c0_69 = arith.constant 0 : index
    %160 = vector.load %arg20[%c0_68, %c0_69] : memref<50x32xf32, #tpu.memory_space<vmem>>, vector<10x32xf32>
    %cst_70 = arith.constant dense<0.000000e+00> : vector<10x32xf32>
    %161 = tpu.matmul %160, %141, %cst_70 {dimension_numbers = #tpu.dot_dimension_numbers<[1], [0], [0], [1], [0, 0, 1, 1], [], []>} : vector<10x32xf32>, vector<32x32xf32>, vector<10x32xf32> -> vector<10x32xf32>
    %162 = vector.broadcast %143 : vector<1x32xf32> to vector<10x32xf32>
    %163 = arith.addf %161, %162 : vector<10x32xf32>
    %164 = arith.addf %131, %163 : vector<10x32xf32>
    %cst_71 = arith.constant dense<0.000000e+00> : vector<10x32xf32>
    %165 = tpu.matmul %164, %145, %cst_71 {dimension_numbers = #tpu.dot_dimension_numbers<[1], [0], [0], [1], [0, 0, 1, 1], [], []>} : vector<10x32xf32>, vector<32x32xf32>, vector<10x32xf32> -> vector<10x32xf32>
    %166 = vector.broadcast %147 : vector<1x32xf32> to vector<10x32xf32>
    %167 = arith.addf %165, %166 : vector<10x32xf32>
    %168 = arith.addf %164, %167 : vector<10x32xf32>
    %c1 = arith.constant 1 : index
    %c0_72 = arith.constant 0 : index
    %c0_73 = arith.constant 0 : index
    %169 = vector.load %arg9[%c1, %c0_72, %c0_73] : memref<2x32x32xf32, #tpu.memory_space<vmem>>, vector<1x32x32xf32>
    %170 = vector.shape_cast %169 : vector<1x32x32xf32> to vector<32x32xf32>
    %c1_74 = arith.constant 1 : index
    %c0_75 = arith.constant 0 : index
    %c0_76 = arith.constant 0 : index
    %171 = vector.load %arg10[%c1_74, %c0_75, %c0_76] : memref<2x1x32xf32, #tpu.memory_space<vmem>>, vector<1x1x32xf32>
    %172 = vector.shape_cast %171 : vector<1x1x32xf32> to vector<1x32xf32>
    %c1_77 = arith.constant 1 : index
    %c0_78 = arith.constant 0 : index
    %c0_79 = arith.constant 0 : index
    %173 = vector.load %arg11[%c1_77, %c0_78, %c0_79] : memref<2x32x32xf32, #tpu.memory_space<vmem>>, vector<1x32x32xf32>
    %174 = vector.shape_cast %173 : vector<1x32x32xf32> to vector<32x32xf32>
    %c1_80 = arith.constant 1 : index
    %c0_81 = arith.constant 0 : index
    %c0_82 = arith.constant 0 : index
    %175 = vector.load %arg12[%c1_80, %c0_81, %c0_82] : memref<2x1x32xf32, #tpu.memory_space<vmem>>, vector<1x1x32xf32>
    %176 = vector.shape_cast %175 : vector<1x1x32xf32> to vector<1x32xf32>
    %c1_83 = arith.constant 1 : index
    %c0_84 = arith.constant 0 : index
    %c0_85 = arith.constant 0 : index
    %177 = vector.load %arg13[%c1_83, %c0_84, %c0_85] : memref<2x32x32xf32, #tpu.memory_space<vmem>>, vector<1x32x32xf32>
    %178 = vector.shape_cast %177 : vector<1x32x32xf32> to vector<32x32xf32>
    %c1_86 = arith.constant 1 : index
    %c0_87 = arith.constant 0 : index
    %c0_88 = arith.constant 0 : index
    %179 = vector.load %arg14[%c1_86, %c0_87, %c0_88] : memref<2x1x32xf32, #tpu.memory_space<vmem>>, vector<1x1x32xf32>
    %180 = vector.shape_cast %179 : vector<1x1x32xf32> to vector<1x32xf32>
    %c1_89 = arith.constant 1 : index
    %c0_90 = arith.constant 0 : index
    %c0_91 = arith.constant 0 : index
    %181 = vector.load %arg15[%c1_89, %c0_90, %c0_91] : memref<2x32x32xf32, #tpu.memory_space<vmem>>, vector<1x32x32xf32>
    %182 = vector.shape_cast %181 : vector<1x32x32xf32> to vector<32x32xf32>
    %c1_92 = arith.constant 1 : index
    %c0_93 = arith.constant 0 : index
    %c0_94 = arith.constant 0 : index
    %183 = vector.load %arg16[%c1_92, %c0_93, %c0_94] : memref<2x1x32xf32, #tpu.memory_space<vmem>>, vector<1x1x32xf32>
    %184 = vector.shape_cast %183 : vector<1x1x32xf32> to vector<1x32xf32>
    %cst_95 = arith.constant dense<0.000000e+00> : vector<10x32xf32>
    %185 = tpu.matmul %168, %170, %cst_95 {dimension_numbers = #tpu.dot_dimension_numbers<[1], [0], [0], [1], [0, 0, 1, 1], [], []>} : vector<10x32xf32>, vector<32x32xf32>, vector<10x32xf32> -> vector<10x32xf32>
    %186 = vector.broadcast %172 : vector<1x32xf32> to vector<10x32xf32>
    %187 = arith.addf %185, %186 : vector<10x32xf32>
    %c0_96 = arith.constant 0 : index
    %c0_97 = arith.constant 0 : index
    %188 = vector.load %arg20[%c0_96, %c0_97] : memref<50x32xf32, #tpu.memory_space<vmem>>, vector<10x32xf32>
    %189 = arith.addf %188, %187 : vector<10x32xf32>
    %c0_98 = arith.constant 0 : index
    %c0_99 = arith.constant 0 : index
    %190 = vector.load %arg20[%c0_98, %c0_99] : memref<50x32xf32, #tpu.memory_space<vmem>>, vector<10x32xf32>
    tpu.vector_store %arg20[%c0_98, %c0_99], %189 {strides = array<i32>} : memref<50x32xf32, #tpu.memory_space<vmem>>, vector<10x32xf32>,
    %c0_100 = arith.constant 0 : index
    %c0_101 = arith.constant 0 : index
    %191 = vector.load %arg20[%c0_100, %c0_101] : memref<50x32xf32, #tpu.memory_space<vmem>>, vector<50x32xf32>
    %cst_102 = arith.constant dense<0.000000e+00> : vector<50x32xf32>
    %192 = tpu.matmul %191, %174, %cst_102 {dimension_numbers = #tpu.dot_dimension_numbers<[1], [0], [0], [1], [0, 0, 1, 1], [], []>} : vector<50x32xf32>, vector<32x32xf32>, vector<50x32xf32> -> vector<50x32xf32>
    %193 = vector.broadcast %176 : vector<1x32xf32> to vector<50x32xf32>
    %194 = arith.addf %192, %193 : vector<50x32xf32>
    %195 = arith.addf %191, %194 : vector<50x32xf32>
    %c0_103 = arith.constant 0 : index
    %c0_104 = arith.constant 0 : index
    %196 = vector.load %arg20[%c0_103, %c0_104] : memref<50x32xf32, #tpu.memory_space<vmem>>, vector<50x32xf32>
    tpu.vector_store %arg20[%c0_103, %c0_104], %195 {strides = array<i32>} : memref<50x32xf32, #tpu.memory_space<vmem>>, vector<50x32xf32>,
    %c0_105 = arith.constant 0 : index
    %c0_106 = arith.constant 0 : index
    %197 = vector.load %arg20[%c0_105, %c0_106] : memref<50x32xf32, #tpu.memory_space<vmem>>, vector<10x32xf32>
    %cst_107 = arith.constant dense<0.000000e+00> : vector<10x32xf32>
    %198 = tpu.matmul %197, %178, %cst_107 {dimension_numbers = #tpu.dot_dimension_numbers<[1], [0], [0], [1], [0, 0, 1, 1], [], []>} : vector<10x32xf32>, vector<32x32xf32>, vector<10x32xf32> -> vector<10x32xf32>
    %199 = vector.broadcast %180 : vector<1x32xf32> to vector<10x32xf32>
    %200 = arith.addf %198, %199 : vector<10x32xf32>
    %201 = arith.addf %168, %200 : vector<10x32xf32>
    %cst_108 = arith.constant dense<0.000000e+00> : vector<10x32xf32>
    %202 = tpu.matmul %201, %182, %cst_108 {dimension_numbers = #tpu.dot_dimension_numbers<[1], [0], [0], [1], [0, 0, 1, 1], [], []>} : vector<10x32xf32>, vector<32x32xf32>, vector<10x32xf32> -> vector<10x32xf32>
    %203 = vector.broadcast %184 : vector<1x32xf32> to vector<10x32xf32>
    %204 = arith.addf %202, %203 : vector<10x32xf32>
    %205 = arith.addf %201, %204 : vector<10x32xf32>
    %206 = vector.extract_strided_slice %205 {offsets = [0, 0], sizes = [1, 32], strides = [1, 1]} : vector<10x32xf32> to vector<1x32xf32>
    %207 = vector.extract_strided_slice %205 {offsets = [5, 0], sizes = [1, 32], strides = [1, 1]} : vector<10x32xf32> to vector<1x32xf32>
    %cst_109 = arith.constant 0.000000e+00 : f32
    %208 = vector.broadcast %cst_109 : f32 to vector<6x32xf32>
    %209 = tpu.concatenate %206, %207, %208 in 0 : vector<1x32xf32>, vector<1x32xf32>, vector<6x32xf32> -> vector<8x32xf32>
    %c0_110 = arith.constant 0 : index
    %c0_111 = arith.constant 0 : index
    %210 = vector.load %arg17[%c0_110, %c0_111] : memref<32x128xf32, #tpu.memory_space<vmem>>, vector<32x128xf32>
    %cst_112 = arith.constant dense<0.000000e+00> : vector<8x128xf32>
    %211 = tpu.matmul %209, %210, %cst_112 {dimension_numbers = #tpu.dot_dimension_numbers<[1], [0], [0], [1], [0, 0, 1, 1], [], []>} : vector<8x32xf32>, vector<32x128xf32>, vector<8x128xf32> -> vector<8x128xf32>
    %c0_113 = arith.constant 0 : index
    %c0_114 = arith.constant 0 : index
    %212 = vector.load %arg18[%c0_113, %c0_114] : memref<1x128xf32, #tpu.memory_space<vmem>>, vector<1x128xf32>
    %213 = vector.broadcast %212 : vector<1x128xf32> to vector<8x128xf32>
    %214 = arith.addf %211, %213 : vector<8x128xf32>
    %c0_115 = arith.constant 0 : index
    %c0_116 = arith.constant 0 : index
    %215 = vector.load %arg19[%c0_115, %c0_116] : memref<8x128xf32, #tpu.memory_space<vmem>>, vector<8x128xf32>
    tpu.vector_store %arg19[%c0_115, %c0_116], %214 {strides = array<i32>} : memref<8x128xf32, #tpu.memory_space<vmem>>, vector<8x128xf32>,
    return
  }
  func.func @transform_0(%arg0: i32) -> (i32, i32, i32, i32) {
    %c0_i32 = arith.constant 0 : i32
    %c0_i32_0 = arith.constant 0 : i32
    %c0_i32_1 = arith.constant 0 : i32
    %c0_i32_2 = arith.constant 0 : i32
    %c0_i32_3 = arith.constant 0 : i32
    return %c0_i32, %c0_i32_0, %c0_i32_1, %c0_i32_2 : i32, i32, i32, i32
  }
  func.func @transform_1(%arg0: i32) -> (i32, i32, i32) {
    %c0_i32 = arith.constant 0 : i32
    %c0_i32_0 = arith.constant 0 : i32
    %c0_i32_1 = arith.constant 0 : i32
    %c0_i32_2 = arith.constant 0 : i32
    return %c0_i32, %c0_i32_0, %c0_i32_1 : i32, i32, i32
  }
  func.func @transform_2(%arg0: i32) -> (i32, i32) {
    %c0_i32 = arith.constant 0 : i32
    %c0_i32_0 = arith.constant 0 : i32
    %c0_i32_1 = arith.constant 0 : i32
    return %c0_i32, %c0_i32_0 : i32, i32
  }
  func.func @transform_3(%arg0: i32) -> (i32, i32, i32) {
    %c0_i32 = arith.constant 0 : i32
    %c0_i32_0 = arith.constant 0 : i32
    %c0_i32_1 = arith.constant 0 : i32
    %c0_i32_2 = arith.constant 0 : i32
    return %c0_i32, %c0_i32_0, %c0_i32_1 : i32, i32, i32
  }
  func.func @transform_4(%arg0: i32) -> (i32, i32) {
    %c0_i32 = arith.constant 0 : i32
    %c0_i32_0 = arith.constant 0 : i32
    %c0_i32_1 = arith.constant 0 : i32
    return %c0_i32, %c0_i32_0 : i32, i32
  }
  func.func @transform_5(%arg0: i32) -> (i32, i32) {
    %c0_i32 = arith.constant 0 : i32
    %c0_i32_0 = arith.constant 0 : i32
    %c0_i32_1 = arith.constant 0 : i32
    return %c0_i32, %c0_i32_0 : i32, i32
  }
  func.func @transform_6(%arg0: i32) -> (i32, i32) {
    %c0_i32 = arith.constant 0 : i32
    %c0_i32_0 = arith.constant 0 : i32
    %c0_i32_1 = arith.constant 0 : i32
    return %c0_i32, %c0_i32_0 : i32, i32
  }
  func.func @transform_7(%arg0: i32) -> (i32, i32) {
    %c0_i32 = arith.constant 0 : i32
    %c0_i32_0 = arith.constant 0 : i32
    %c0_i32_1 = arith.constant 0 : i32
    return %c0_i32, %c0_i32_0 : i32, i32
  }
  func.func @transform_8(%arg0: i32) -> (i32, i32, i32) {
    %c0_i32 = arith.constant 0 : i32
    %c0_i32_0 = arith.constant 0 : i32
    %c0_i32_1 = arith.constant 0 : i32
    %c0_i32_2 = arith.constant 0 : i32
    return %c0_i32, %c0_i32_0, %c0_i32_1 : i32, i32, i32
  }
  func.func @transform_9(%arg0: i32) -> (i32, i32, i32) {
    %c0_i32 = arith.constant 0 : i32
    %c0_i32_0 = arith.constant 0 : i32
    %c0_i32_1 = arith.constant 0 : i32
    %c0_i32_2 = arith.constant 0 : i32
    return %c0_i32, %c0_i32_0, %c0_i32_1 : i32, i32, i32
  }
  func.func @transform_10(%arg0: i32) -> (i32, i32, i32) {
    %c0_i32 = arith.constant 0 : i32
    %c0_i32_0 = arith.constant 0 : i32
    %c0_i32_1 = arith.constant 0 : i32
    %c0_i32_2 = arith.constant 0 : i32
    return %c0_i32, %c0_i32_0, %c0_i32_1 : i32, i32, i32
  }
  func.func @transform_11(%arg0: i32) -> (i32, i32, i32) {
    %c0_i32 = arith.constant 0 : i32
    %c0_i32_0 = arith.constant 0 : i32
    %c0_i32_1 = arith.constant 0 : i32
    %c0_i32_2 = arith.constant 0 : i32
    return %c0_i32, %c0_i32_0, %c0_i32_1 : i32, i32, i32
  }
  func.func @transform_12(%arg0: i32) -> (i32, i32, i32) {
    %c0_i32 = arith.constant 0 : i32
    %c0_i32_0 = arith.constant 0 : i32
    %c0_i32_1 = arith.constant 0 : i32
    %c0_i32_2 = arith.constant 0 : i32
    return %c0_i32, %c0_i32_0, %c0_i32_1 : i32, i32, i32
  }
  func.func @transform_13(%arg0: i32) -> (i32, i32, i32) {
    %c0_i32 = arith.constant 0 : i32
    %c0_i32_0 = arith.constant 0 : i32
    %c0_i32_1 = arith.constant 0 : i32
    %c0_i32_2 = arith.constant 0 : i32
    return %c0_i32, %c0_i32_0, %c0_i32_1 : i32, i32, i32
  }
  func.func @transform_14(%arg0: i32) -> (i32, i32, i32) {
    %c0_i32 = arith.constant 0 : i32
    %c0_i32_0 = arith.constant 0 : i32
    %c0_i32_1 = arith.constant 0 : i32
    %c0_i32_2 = arith.constant 0 : i32
    return %c0_i32, %c0_i32_0, %c0_i32_1 : i32, i32, i32
  }
  func.func @transform_15(%arg0: i32) -> (i32, i32, i32) {
    %c0_i32 = arith.constant 0 : i32
    %c0_i32_0 = arith.constant 0 : i32
    %c0_i32_1 = arith.constant 0 : i32
    %c0_i32_2 = arith.constant 0 : i32
    return %c0_i32, %c0_i32_0, %c0_i32_1 : i32, i32, i32
  }
  func.func @transform_16(%arg0: i32) -> (i32, i32) {
    %c0_i32 = arith.constant 0 : i32
    %c0_i32_0 = arith.constant 0 : i32
    %c0_i32_1 = arith.constant 0 : i32
    return %c0_i32, %c0_i32_0 : i32, i32
  }
  func.func @transform_17(%arg0: i32) -> (i32, i32) {
    %c0_i32 = arith.constant 0 : i32
    %c0_i32_0 = arith.constant 0 : i32
    %c0_i32_1 = arith.constant 0 : i32
    return %c0_i32, %c0_i32_0 : i32, i32
  }
  func.func @transform_18(%arg0: i32) -> (i32, i32) {
    %c0_i32 = arith.constant 0 : i32
    %c0_i32_0 = arith.constant 0 : i32
    %c0_i32_1 = arith.constant 0 : i32
    return %c0_i32, %c0_i32_0 : i32, i32
  }
}

</mosaic_0001>

<bundles_post_ra>
// kernel: brainwavenet_forward.1
= control target key start
LH: loop header
LB: loop body
LE: loop exit
PB: predicated region body
PF: predicated region fallthrough
CT: control target
= control target key end

     0   :  { %s3059_s0 = inlined_call_operand.vmem [shape: f32[2,4,4,32], index: 0, kind: input, shape index: {}]   ;;  %s3060_s1 = inlined_call_operand.hbm [shape: f32[4,4,32], index: 1, kind: input, shape index: {}]   ;;  %s3061_s2 = inlined_call_operand.hbm [shape: f32[4,32], index: 2, kind: input, shape index: {}]   ;;  %s3062_s3 = inlined_call_operand.hbm [shape: f32[4,4,32], index: 3, kind: input, shape index: {}]   ;;  %s3063_s4 = inlined_call_operand.hbm [shape: f32[4,32], index: 4, kind: input, shape index: {}]   ;;  %s3064_s5 = inlined_call_operand.hbm [shape: f32[5,32], index: 5, kind: input, shape index: {}]   ;;  %s3065_s6 = inlined_call_operand.hbm [shape: f32[4,32], index: 6, kind: input, shape index: {}]   ;;  %s3066_s7 = inlined_call_operand.hbm [shape: f32[5,32], index: 7, kind: input, shape index: {}]   ;;  %s3067_s8 = inlined_call_operand.vmem [shape: f32[2,32,32], index: 8, kind: input, shape index: {}]   ;;  %s3068_s9 = inlined_call_operand.hbm [shape: f32[2,1,32], index: 9, kind: input, shape index: {}]   ;;  %s3069_s10 = inlined_call_operand.vmem [shape: f32[2,32,32], index: 10, kind: input, shape index: {}]   ;;  %s3070_s11 = inlined_call_operand.vmem [shape: f32[2,1,32], index: 11, kind: input, shape index: {}]   ;;  %s3071_s12 = inlined_call_operand.vmem [shape: f32[2,32,32], index: 12, kind: input, shape index: {}]   ;;  %s3072_s13 = inlined_call_operand.hbm [shape: f32[2,1,32], index: 13, kind: input, shape index: {}]   ;;  %s3073_s14 = inlined_call_operand.vmem [shape: f32[2,32,32], index: 14, kind: input, shape index: {}]   ;;  %s3074_s15 = inlined_call_operand.hbm [shape: f32[2,1,32], index: 15, kind: input, shape index: {}]   ;;  %s3075_s16 = inlined_call_operand.vmem [shape: f32[32,128], index: 16, kind: input, shape index: {}]   ;;  %s3076_s17 = inlined_call_operand.hbm [shape: f32[1,128], index: 17, kind: input, shape index: {}]   ;;  %s3077_s18 = inlined_call_operand.vmem [shape: f32[8,128], index: 18, kind: output, shape index: {}]  }
   0x1   :  { %3081 = sst [smem:[#allocation26_spill]] %s3059_s0 }
   0x2   :  { %3082 = sst [smem:[#allocation27_spill]] %s3060_s1 }
   0x3   :  { %3083 = sst [smem:[#allocation28_spill]] %s3061_s2 }
   0x4   :  { %23 = vsyncpa [#allocation4], 0 }
   0x5   :  { %24 = vsyncpa [#allocation6], 0 }
   0x6   :  { %25 = vsyncpa [#allocation9], 0 }
   0x7   :  { %26 = vsyncpa [#allocation12], 0 }
   0x8   :  { %27 = vsyncpa [#allocation15], 0 }
   0x9   :  { %28 = vsyncpa [#allocation18], 0  ;;  %s2251_s27 = smov [#allocation5]   ;;  %s2252_s29 = smov [#allocation8]  }
   0xa   :  { %s49_s28 = sshll.u32 %s2251_s27, 4  ;;  %s71_s30 = sshll.u32 %s2252_s29, 4  ;;  %s50_s28 = int_to_ptr.vmem [resolvable:$true] %s49_s28  ;;  %s72_s30 = int_to_ptr.vmem [resolvable:$true] %s71_s30 }
   0xb   :  { %s3084_s1 = sld [smem:[#allocation28_spill]] }
  0x11   :  { %s1997_s20 = scalar_lea.hbm %s3084_s1, 64 }
  0x12   :  { %p1998_p0 = scmp.ne.s32.totalorder %s3084_s1, %s1997_s20  ;;  %p2001_p1 = scmp.lt.u32.totalorder %s1997_s20, %s3084_s1 }
  0x14   :  { %p2003_p2 = pnand %p2001_p1, %p1998_p0 }
  0x16   :  { %2006 = shalt.err (!%p2003_p2)
}
  0x17   :  { %s2007_s24 = scalar_lea.vmem %s50_s28, 64  ;;  %p2012_p4 = scmp.lt.s32.totalorder %s50_s28, %s50_s28 }
  0x18   :  { %p2008_p3 = scmp.ne.s32.totalorder %s50_s28, %s2007_s24  ;;  %p2013_p5 = scmp.lt.s32.totalorder %s2007_s24, %s2007_s24 }
  0x1a   :  { %p2014_p6 = por %p2013_p5, %p2012_p4 }
  0x1c   :  { %p2015_p7 = pnand %p2014_p6, %p2008_p3 }
  0x1e   :  { %2018 = shalt.err (!%p2015_p7)
}
  0x1f   :  { %52 = dma.hbm_to_vmem [thread:$0]  %s3084_s1, 64, %s50_s28, [#allocation6]  }
  0x20   :  { %s2019_s0 = scalar_lea.hbm %s3063_s4, 64 }
  0x21   :  { %p2020_p8 = scmp.ne.s32.totalorder %s3063_s4, %s2019_s0  ;;  %p2023_p9 = scmp.lt.u32.totalorder %s2019_s0, %s3063_s4 }
  0x23   :  { %p2025_p10 = pnand %p2023_p9, %p2020_p8 }
  0x25   :  { %2028 = shalt.err (!%p2025_p10)
}
  0x26   :  { %s2029_s2 = scalar_lea.vmem %s72_s30, 64  ;;  %p2034_p12 = scmp.lt.s32.totalorder %s72_s30, %s72_s30 }
  0x27   :  { %p2030_p11 = scmp.ne.s32.totalorder %s72_s30, %s2029_s2  ;;  %p2035_p13 = scmp.lt.s32.totalorder %s2029_s2, %s2029_s2 }
  0x29   :  { %p2036_p0 = por %p2035_p13, %p2034_p12 }
  0x2b   :  { %p2037_p1 = pnand %p2036_p0, %p2030_p11 }
  0x2d   :  { %2040 = shalt.err (!%p2037_p1)
}
  0x2e   :  { %74 = dma.hbm_to_vmem [thread:$0]  %s3063_s4, 64, %s72_s30, [#allocation9]  }
  0x2f   :  { %s2253_s23 = smov [#allocation11]   ;;  %s2254_s25 = smov [#allocation14]  }
  0x30   :  { %s91_s24 = sshll.u32 %s2253_s23, 4  ;;  %s112_s26 = sshll.u32 %s2254_s25, 4  ;;  %s92_s24 = int_to_ptr.vmem [resolvable:$true] %s91_s24  ;;  %s2388_s26 = int_to_ptr.vmem [resolvable:$true] %s112_s26 }
  0x31   :  { %s2041_s0 = scalar_lea.hbm %s3065_s6, 64 }
  0x32   :  { %p2042_p2 = scmp.ne.s32.totalorder %s3065_s6, %s2041_s0  ;;  %p2045_p3 = scmp.lt.u32.totalorder %s2041_s0, %s3065_s6 }
  0x34   :  { %p2047_p4 = pnand %p2045_p3, %p2042_p2 }
  0x36   :  { %2050 = shalt.err (!%p2047_p4)
}
  0x37   :  { %s2051_s4 = scalar_lea.vmem %s92_s24, 64  ;;  %p2056_p6 = scmp.lt.s32.totalorder %s92_s24, %s92_s24 }
  0x38   :  { %p2052_p5 = scmp.ne.s32.totalorder %s92_s24, %s2051_s4  ;;  %p2057_p7 = scmp.lt.s32.totalorder %s2051_s4, %s2051_s4 }
  0x3a   :  { %p2058_p8 = por %p2057_p7, %p2056_p6 }
  0x3c   :  { %p2059_p9 = pnand %p2058_p8, %p2052_p5 }
  0x3e   :  { %2062 = shalt.err (!%p2059_p9)
}
  0x3f   :  { %94 = dma.hbm_to_vmem [thread:$0]  %s3065_s6, 64, %s92_s24, [#allocation12]  }
  0x40   :  { %s2063_s23 = scalar_lea.hbm %s3068_s9, 32 }
  0x41   :  { %p2064_p10 = scmp.ne.s32.totalorder %s3068_s9, %s2063_s23  ;;  %p2067_p11 = scmp.lt.u32.totalorder %s2063_s23, %s3068_s9 }
  0x43   :  { %p2069_p12 = pnand %p2067_p11, %p2064_p10 }
  0x45   :  { %2072 = shalt.err (!%p2069_p12)
}
  0x46   :  { %s2073_s19 = scalar_lea.vmem %s2388_s26, 32  ;;  %p2078_p0 = scmp.lt.s32.totalorder %s2388_s26, %s2388_s26 }
  0x47   :  { %p2074_p13 = scmp.ne.s32.totalorder %s2388_s26, %s2073_s19  ;;  %p2079_p1 = scmp.lt.s32.totalorder %s2073_s19, %s2073_s19 }
  0x49   :  { %p2080_p2 = por %p2079_p1, %p2078_p0 }
  0x4b   :  { %p2081_p3 = pnand %p2080_p2, %p2074_p13 }
  0x4d   :  { %2084 = shalt.err (!%p2081_p3)
}
  0x4e   :  { %s2255_s6 = smov 16   ;;  %s2256_s24 = smov 1  }
  0x4f   :  { %118 = dma.hbm_to_vmem [thread:$0]  %s3068_s9, 32, %s2388_s26, [#allocation15], %s2255_s6, %s2255_s6, %s2256_s24  }
  0x50   :  { %s2257_s22 = smov [#allocation17]   ;;  %s2258_s30 = smov [#allocation3]  }
  0x51   :  { %s144_s4 = sshll.u32 %s2257_s22, 4  ;;  %s36_s2 = sshll.u32 %s2258_s30, 4  ;;  %s145_s4 = int_to_ptr.vmem [resolvable:$true] %s144_s4  ;;  %s2422_s2 = int_to_ptr.vmem [resolvable:$true] %s36_s2 }
  0x52   :  { %s2085_s23 = scalar_lea.hbm %s3074_s15, 32 }
  0x53   :  { %p2086_p4 = scmp.ne.s32.totalorder %s3074_s15, %s2085_s23  ;;  %p2089_p5 = scmp.lt.u32.totalorder %s2085_s23, %s3074_s15 }
  0x55   :  { %p2091_p6 = pnand %p2089_p5, %p2086_p4 }
  0x57   :  { %2094 = shalt.err (!%p2091_p6)
}
  0x58   :  { %s2095_s9 = scalar_lea.vmem %s145_s4, 32  ;;  %p2100_p8 = scmp.lt.s32.totalorder %s145_s4, %s145_s4 }
  0x59   :  { %p2096_p7 = scmp.ne.s32.totalorder %s145_s4, %s2095_s9  ;;  %p2101_p9 = scmp.lt.s32.totalorder %s2095_s9, %s2095_s9 }
  0x5b   :  { %p2102_p10 = por %p2101_p9, %p2100_p8 }
  0x5d   :  { %p2103_p11 = pnand %p2102_p10, %p2096_p7 }
  0x5f   :  { %2106 = shalt.err (!%p2103_p11)
}
  0x60   :  { %150 = dma.hbm_to_vmem [thread:$0]  %s3074_s15, 32, %s145_s4, [#allocation18], %s2255_s6, %s2255_s6, %s2256_s24  }
  0x61   :  { %s3085_s22 = sld [smem:[#allocation27_spill]] }
  0x67   :  { %s2107_s30 = scalar_lea.hbm %s3085_s22, 256 }
  0x68   :  { %p2108_p12 = scmp.ne.s32.totalorder %s3085_s22, %s2107_s30  ;;  %p2111_p13 = scmp.lt.u32.totalorder %s2107_s30, %s3085_s22 }
  0x6a   :  { %p2113_p0 = pnand %p2111_p13, %p2108_p12 }
  0x6c   :  { %2116 = shalt.err (!%p2113_p0)
}
  0x6d   :  { %s2117_s27 = scalar_lea.vmem %s2422_s2, 256  ;;  %p2122_p2 = scmp.lt.s32.totalorder %s2422_s2, %s2422_s2 }
  0x6e   :  { %p2118_p1 = scmp.ne.s32.totalorder %s2422_s2, %s2117_s27  ;;  %p2123_p3 = scmp.lt.s32.totalorder %s2117_s27, %s2117_s27 }
  0x70   :  { %p2124_p4 = por %p2123_p3, %p2122_p2 }
  0x72   :  { %p2125_p5 = pnand %p2124_p4, %p2118_p1 }
  0x74   :  { %2128 = shalt.err (!%p2125_p5)
}
  0x75   :  { %s2259_s15 = smov 64   ;;  %s2260_s4 = smov 4  }
  0x76   :  { %42 = dma.hbm_to_vmem [thread:$0]  %s3085_s22, 256, %s2422_s2, [#allocation4], %s2259_s15, %s2259_s15, %s2260_s4  }
  0x77   :  { %s2261_s9 = smov [#allocation7]   ;;  %s2262_s19 = smov [#allocation10]  }
  0x78   :  { %s58_s26 = sshll.u32 %s2261_s9, 4  ;;  %s81_s21 = sshll.u32 %s2262_s19, 4  ;;  %s59_s26 = int_to_ptr.vmem [resolvable:$true] %s58_s26  ;;  %s82_s21 = int_to_ptr.vmem [resolvable:$true] %s81_s21 }
  0x79   :  { %s2129_s28 = scalar_lea.hbm %s3062_s3, 256 }
  0x7a   :  { %p2130_p6 = scmp.ne.s32.totalorder %s3062_s3, %s2129_s28  ;;  %p2133_p7 = scmp.lt.u32.totalorder %s2129_s28, %s3062_s3 }
  0x7c   :  { %p2135_p8 = pnand %p2133_p7, %p2130_p6 }
  0x7e   :  { %2138 = shalt.err (!%p2135_p8)
}
  0x7f   :  { %s2139_s2 = scalar_lea.vmem %s59_s26, 256  ;;  %p2144_p10 = scmp.lt.s32.totalorder %s59_s26, %s59_s26 }
  0x80   :  { %p2140_p9 = scmp.ne.s32.totalorder %s59_s26, %s2139_s2  ;;  %p2145_p11 = scmp.lt.s32.totalorder %s2139_s2, %s2139_s2 }
  0x82   :  { %p2146_p12 = por %p2145_p11, %p2144_p10 }
  0x84   :  { %p2147_p13 = pnand %p2146_p12, %p2140_p9 }
  0x86   :  { %2150 = shalt.err (!%p2147_p13)
}
  0x87   :  { %64 = dma.hbm_to_vmem [thread:$0]  %s3062_s3, 256, %s59_s26, [#allocation6], %s2259_s15, %s2259_s15, %s2260_s4  }
  0x88   :  { %s2151_s19 = scalar_lea.hbm %s3064_s5, 128 }
  0x89   :  { %p2152_p0 = scmp.ne.s32.totalorder %s3064_s5, %s2151_s19  ;;  %p2155_p1 = scmp.lt.u32.totalorder %s2151_s19, %s3064_s5 }
  0x8b   :  { %p2157_p2 = pnand %p2155_p1, %p2152_p0 }
  0x8d   :  { %2160 = shalt.err (!%p2157_p2)
}
  0x8e   :  { %s2161_s23 = scalar_lea.vmem %s82_s21, 128  ;;  %p2166_p4 = scmp.lt.s32.totalorder %s82_s21, %s82_s21 }
  0x8f   :  { %p2162_p3 = scmp.ne.s32.totalorder %s82_s21, %s2161_s23  ;;  %p2167_p5 = scmp.lt.s32.totalorder %s2161_s23, %s2161_s23 }
  0x91   :  { %p2168_p6 = por %p2167_p5, %p2166_p4 }
  0x93   :  { %p2169_p7 = pnand %p2168_p6, %p2162_p3 }
  0x95   :  { %2172 = shalt.err (!%p2169_p7)
}
  0x96   :  { %84 = dma.hbm_to_vmem [thread:$0]  %s3064_s5, 128, %s82_s21, [#allocation9]  }
  0x97   :  { %s2263_s4 = smov [#allocation13]   ;;  %s2264_s25 = smov [#allocation16]  }
  0x98   :  { %s101_s26 = sshll.u32 %s2263_s4, 4  ;;  %s130_s27 = sshll.u32 %s2264_s25, 4  ;;  %s102_s26 = int_to_ptr.vmem [resolvable:$true] %s101_s26  ;;  %s2480_s27 = int_to_ptr.vmem [resolvable:$true] %s130_s27 }
  0x99   :  { %s2173_s29 = scalar_lea.hbm %s3066_s7, 128 }
  0x9a   :  { %p2174_p8 = scmp.ne.s32.totalorder %s3066_s7, %s2173_s29  ;;  %p2177_p9 = scmp.lt.u32.totalorder %s2173_s29, %s3066_s7 }
  0x9c   :  { %p2179_p10 = pnand %p2177_p9, %p2174_p8 }
  0x9e   :  { %2182 = shalt.err (!%p2179_p10)
}
  0x9f   :  { %s2183_s5 = scalar_lea.vmem %s102_s26, 128  ;;  %p2188_p12 = scmp.lt.s32.totalorder %s102_s26, %s102_s26 }
  0xa0   :  { %p2184_p11 = scmp.ne.s32.totalorder %s102_s26, %s2183_s5  ;;  %p2189_p13 = scmp.lt.s32.totalorder %s2183_s5, %s2183_s5 }
  0xa2   :  { %p2190_p0 = por %p2189_p13, %p2188_p12 }
  0xa4   :  { %p2191_p1 = pnand %p2190_p0, %p2184_p11 }
  0xa6   :  { %2194 = shalt.err (!%p2191_p1)
}
  0xa7   :  { %104 = dma.hbm_to_vmem [thread:$0]  %s3066_s7, 128, %s102_s26, [#allocation12]  }
  0xa8   :  { %s2195_s23 = scalar_lea.hbm %s3072_s13, 32 }
  0xa9   :  { %p2196_p2 = scmp.ne.s32.totalorder %s3072_s13, %s2195_s23  ;;  %p2199_p3 = scmp.lt.u32.totalorder %s2195_s23, %s3072_s13 }
  0xab   :  { %p2201_p4 = pnand %p2199_p3, %p2196_p2 }
  0xad   :  { %2204 = shalt.err (!%p2201_p4)
}
  0xae   :  { %s2205_s2 = scalar_lea.vmem %s2480_s27, 32  ;;  %p2210_p6 = scmp.lt.s32.totalorder %s2480_s27, %s2480_s27 }
  0xaf   :  { %p2206_p5 = scmp.ne.s32.totalorder %s2480_s27, %s2205_s2  ;;  %p2211_p7 = scmp.lt.s32.totalorder %s2205_s2, %s2205_s2 }
  0xb1   :  { %p2212_p8 = por %p2211_p7, %p2210_p6 }
  0xb3   :  { %p2213_p9 = pnand %p2212_p8, %p2206_p5 }
  0xb5   :  { %2216 = shalt.err (!%p2213_p9)
}
  0xb6   :  { %136 = dma.hbm_to_vmem [thread:$0]  %s3072_s13, 32, %s2480_s27, [#allocation15], %s2255_s6, %s2255_s6, %s2256_s24  }
  0xb7   :  { %s2265_s22 = smov [#allocation19]   ;;  %s2217_s19 = scalar_lea.hbm %s3076_s17, 16 }
  0xb8   :  { %s159_s29 = sshll.u32 %s2265_s22, 4  ;;  %p2218_p10 = scmp.ne.s32.totalorder %s3076_s17, %s2217_s19  ;;  %s160_s29 = int_to_ptr.vmem [resolvable:$true] %s159_s29 }
  0xb9   :  { %p2221_p11 = scmp.lt.u32.totalorder %s2217_s19, %s3076_s17 }
  0xbb   :  { %p2223_p12 = pnand %p2221_p11, %p2218_p10 }
  0xbd   :  { %2226 = shalt.err (!%p2223_p12)
}
  0xbe   :  { %s2227_s28 = scalar_lea.vmem %s160_s29, 16  ;;  %s2231_s13 = scalar_lea.vmem %s160_s29, 32 }
  0xbf   :  { %p2228_p13 = scmp.ne.s32.totalorder %s160_s29, %s2227_s28  ;;  %p2232_p0 = scmp.lt.s32.totalorder %s160_s29, %s160_s29 }
  0xc0   :  { %p2233_p1 = scmp.lt.s32.totalorder %s2231_s13, %s2227_s28 }
  0xc2   :  { %p2234_p2 = por %p2233_p1, %p2232_p0 }
  0xc4   :  { %p2235_p3 = pnand %p2234_p2, %p2228_p13 }
  0xc6   :  { %2238 = shalt.err (!%p2235_p3)
}
  0xc7   :  { %162 = dma.hbm_to_vmem [thread:$0]  %s3076_s17, 16, %s160_s29, [#allocation18]  }
  0xc8   :  { %2239 = dma.done.wait [#allocation4], 256  }
  0xc9   :  { %2240 = vsyncadd [#allocation4], 4294967040 }
  0xca   :  { %2241 = dma.done.wait [#allocation6], 320  }
  0xcb   :  { %2242 = vsyncadd [#allocation6], 4294966976 }
  0xcc   :  { %2243 = dma.done.wait [#allocation9], 192  }
  0xcd   :  { %2244 = vsyncadd [#allocation9], 4294967104 }
  0xce   :  { %2245 = dma.done.wait [#allocation12], 192  }
  0xcf   :  { %2246 = vsyncadd [#allocation12], 4294967104 }
  0xd0   :  { %2247 = dma.done.wait [#allocation15], 64  }
  0xd1   :  { %2248 = vsyncadd [#allocation15], 4294967232 }
  0xd2   :  { %2249 = dma.done.wait [#allocation18], 48  }
  0xd3   :  { %2250 = vsyncadd [#allocation18], 4294967248  ;;  %vm624_vm0 = vcmask 261120   ;;  %v214_v0 = vlaneseq  ;;  %v2266_v1 = vmov 0.0   ;;  %vm631_vm1 = vcmask 254976   ;;  %v675_v5 = vld [vmem:[%s3067_s8] sm:$0xff] }
  0xd4   :  { %625 = vst.msk [vmem:[#allocation2] sm:$0xff] %vm624_vm0, %v2266_v1  ;;  %626 = vst.msk [vmem:[#allocation2 + $0x8] sm:$0xff] %vm624_vm0, %v2266_v1  ;;  %v676_v6 = vld [vmem:[%s3067_s8 + $0x8] sm:$0xff]  ;;  %v677_v7 = vld [vmem:[%s3067_s8 + $0x10] sm:$0xff]  ;;  %vm673_vm2 = vcmask 1044480   ;;  %vm633_vm3 = vcmask 258048  }
  0xd5   :  { %630 = vst.msk [vmem:[#allocation2 + $0x28] sm:$0xff] %vm624_vm0, %v2266_v1  ;;  %627 = vst.msk [vmem:[#allocation2 + $0x10] sm:$0xff] %vm624_vm0, %v2266_v1  ;;  %v215_v2 = vshrl.u32 %v214_v0, 7  ;;  %v1913_v8 = vpack.c.bf16 %v676_v6, %v675_v5  ;;  %v678_v9 = vld [vmem:[%s3067_s8 + $0x18] sm:$0xff]  ;;  %v669_v10 = vld [vmem:[#allocation13] sm:$0x1f] }
  0xd6   :  { %628 = vst.msk [vmem:[#allocation2 + $0x18] sm:$0xff] %vm624_vm0, %v2266_v1  ;;  %629 = vst.msk [vmem:[#allocation2 + $0x20] sm:$0xff] %vm624_vm0, %v2266_v1  ;;  %s3086_s26 = sld [smem:[#allocation26_spill]]  ;;  %v1917_v13 = vpack.c.bf16 %v678_v9, %v677_v7  ;;  %v2563_v14 = vrot.slane %v669_v10, 3  ;;  %v2589_v21 = vld [vmem:[#allocation3] sm:$0xf] }
  0xd7   :  { %632 = vst.msk [vmem:[#allocation2 + $0x30] sm:$0x3] %vm631_vm1, %v2266_v1  ;;  %v2540_v3 = vsub.s32 0, %v215_v2  ;;  %v2542_v4 = vsub.s32 1, %v215_v2  ;;  %v2561_v12 = vsub.s32 2, %v215_v2  ;;  %1914 = vmatprep.subr.bf16.mxu0 %v1913_v8  ;;  %v2618_v35 = vsub.s32 3, %v215_v2 }
  0xd8   :  { %1916 = vmatpush3.bf16.msra.mxu0 %v1913_v8  ;;  %v2601_v26 = vsel %vm673_vm2, %v669_v10, %v2563_v14  ;;  %v2603_v27 = vld [vmem:[#allocation3 + $0x4] sm:$0xf]  ;;  %v2612_v31 = vld [vmem:[#allocation5] sm:$0xf]  ;;  %v622_v44 = vld [vmem:[#allocation10] sm:$0x1f] }
  0xd9   :  { %1918 = vmatprep.subr.bf16.mxu0 %v1917_v13  ;;  %1786 = vmatprep.mubr.msk.f32.mxu0 %vm624_vm0, %v2601_v26  ;;  %v2629_v45 = vld [vmem:[#allocation3 + $0x8] sm:$0xf]  ;;  %635 = vst.msk [vmem:[#allocation2 + $0x5] sm:$0x1f] %vm633_vm3, %v622_v44  ;;  %634 = vst.msk [vmem:[#allocation2] sm:$0x1f] %vm633_vm3, %v622_v44 }
  0xda   :  { %v2651_v62 = vld [vmem:[#allocation3 + $0xc] sm:$0xf]  ;;  %v2674_v44 = vld [vmem:[#allocation7 + $0x4] sm:$0xf]  ;;  %vm641_vm4 = vcmask 257024   ;;  %vm2268_vm5 = vmmov 0  }
  0xdb   :  { %1797 = vmatprep.mubr.msk.f32.mxu1 %vm2268_vm5, %v2266_v1  ;;  %vm1563_vm6 = vcmask 1040384   ;;  %vm1565_vm7 = vcmask 1041408  }
  0xdc   :  { %v2559_v11 = vld [vmem:[%s3086_s26] sm:$0xf]  ;;  %v2568_v15 = vld [vmem:[%s3086_s26 + $0x4] sm:$0xf]  ;;  %v2573_v16 = vld [vmem:[%s3086_s26 + $0x8] sm:$0xf]  ;;  %1920 = vmatpush3.bf16.msra.mxu0 %v1917_v13 }
  0xdd   :  { %v217_v17 = vrot.slane %v2559_v11, %v2540_v3  ;;  %v265_v18 = vrot.slane %v2559_v11, %v2542_v4  ;;  %v2582_v19 = vld [vmem:[%s3086_s26 + $0x10] sm:$0xf]  ;;  %v2587_v20 = vld [vmem:[%s3086_s26 + $0x1c] sm:$0xf]  ;;  %v221_v22 = vrot.slane %v2568_v15, %v2540_v3  ;;  %v225_v23 = vrot.slane %v2573_v16, %v2540_v3 }
  0xde   :  { %v269_v24 = vrot.slane %v2568_v15, %v2542_v4  ;;  %v273_v25 = vrot.slane %v2573_v16, %v2542_v4  ;;  %v233_v28 = vrot.slane %v2582_v19, %v2540_v3  ;;  %v245_v29 = vrot.slane %v2587_v20, %v2540_v3 }
  0xdf   :  { %v246_v30 = vmul.f32 %v217_v17, %v2589_v21  ;;  %v247_v32 = vmul.f32 %v221_v22, %v2589_v21  ;;  %v248_v33 = vmul.f32 %v225_v23, %v2589_v21  ;;  %v281_v34 = vrot.slane %v2582_v19, %v2542_v4  ;;  %1787 = vmatmul.mubr.msk.f32.vlgmr.msra.gmra.mrb[0].mxu0 %vm624_vm0, %v2563_v14 }
  0xe0   :  { %v250_v36 = vmul.f32 %v233_v28, %v2589_v21  ;;  %v253_v37 = vmul.f32 %v245_v29, %v2589_v21  ;;  %v293_v39 = vrot.slane %v2587_v20, %v2542_v4  ;;  %v294_v42 = vmul.f32 %v265_v18, %v2603_v27 }
  0xe1   :  { %v254_v38 = vadd.f32 %v246_v30, %v2612_v31  ;;  %v255_v40 = vadd.f32 %v247_v32, %v2612_v31  ;;  %v256_v41 = vadd.f32 %v248_v33, %v2612_v31  ;;  %v295_v43 = vmul.f32 %v269_v24, %v2603_v27 }
  0xe2   :  { %v258_v46 = vadd.f32 %v250_v36, %v2612_v31  ;;  %v261_v47 = vadd.f32 %v253_v37, %v2612_v31  ;;  %v296_v48 = vmul.f32 %v273_v25, %v2603_v27  ;;  %v298_v49 = vmul.f32 %v281_v34, %v2603_v27 }
  0xe3   :  { %v301_v50 = vmul.f32 %v293_v39, %v2603_v27  ;;  %v302_v51 = vadd.f32 %v294_v42, %v254_v38  ;;  %v303_v52 = vadd.f32 %v295_v43, %v255_v40  ;;  %v313_v53 = vrot.slane %v2559_v11, %v2561_v12  ;;  %v2672_v40 = vld [vmem:[#allocation7] sm:$0xf] }
  0xe4   :  { %v304_v54 = vadd.f32 %v296_v48, %v256_v41  ;;  %v306_v55 = vadd.f32 %v298_v49, %v258_v46  ;;  %v317_v56 = vrot.slane %v2568_v15, %v2561_v12  ;;  %v321_v57 = vrot.slane %v2573_v16, %v2561_v12 }
  0xe5   :  { %v309_v58 = vadd.f32 %v301_v50, %v261_v47  ;;  %v329_v59 = vrot.slane %v2582_v19, %v2561_v12  ;;  %v341_v60 = vrot.slane %v2587_v20, %v2561_v12  ;;  %v342_v61 = vmul.f32 %v313_v53, %v2629_v45  ;;  %v2680_v50 = vld [vmem:[#allocation8] sm:$0xf] }
  0xe6   :  { %v343_v63 = vmul.f32 %v317_v56, %v2629_v45  ;;  %v344_v0 = vmul.f32 %v321_v57, %v2629_v45  ;;  %v361_v2 = vrot.slane %v2559_v11, %v2618_v35  ;;  %v365_v5 = vrot.slane %v2568_v15, %v2618_v35 }
  0xe7   :  { %v346_v6 = vmul.f32 %v329_v59, %v2629_v45  ;;  %v349_v7 = vmul.f32 %v341_v60, %v2629_v45  ;;  %v350_v8 = vadd.f32 %v342_v61, %v302_v51  ;;  %v369_v9 = vrot.slane %v2573_v16, %v2618_v35 }
  0xe8   :  { %v351_v10 = vadd.f32 %v343_v63, %v303_v52  ;;  %v352_v13 = vadd.f32 %v344_v0, %v304_v54  ;;  %v377_v17 = vrot.slane %v2582_v19, %v2618_v35  ;;  %v389_v18 = vrot.slane %v2587_v20, %v2618_v35 }
  0xe9   :  { %v354_v22 = vadd.f32 %v346_v6, %v306_v55  ;;  %v357_v23 = vadd.f32 %v349_v7, %v309_v58  ;;  %v390_v24 = vmul.f32 %v361_v2, %v2651_v62  ;;  %v391_v25 = vmul.f32 %v365_v5, %v2651_v62  ;;  %v2698_v7 = vld [vmem:[#allocation7 + $0x8] sm:$0xf] }
  0xea   :  { %v392_v28 = vmul.f32 %v369_v9, %v2651_v62  ;;  %v394_v29 = vmul.f32 %v377_v17, %v2651_v62  ;;  %v397_v30 = vmul.f32 %v389_v18, %v2651_v62 }
  0xeb   :  { %v398_v32 = vadd.f32 %v390_v24, %v350_v8  ;;  %v399_v33 = vadd.f32 %v391_v25, %v351_v10 }
  0xec   :  { %v400_v34 = vadd.f32 %v392_v28, %v352_v13  ;;  %v402_v36 = vadd.f32 %v394_v29, %v354_v22  ;;  %v405_v37 = vadd.f32 %v397_v30, %v357_v23 }
  0xed   :  { %v406_v38 = vmax.f32 %v398_v32, 0.0  ;;  %v407_v39 = vmax.f32 %v399_v33, 0.0 }
  0xee   :  { %v408_v41 = vmax.f32 %v400_v34, 0.0  ;;  %v410_v42 = vmax.f32 %v402_v36, 0.0  ;;  %v413_v43 = vmax.f32 %v405_v37, 0.0  ;;  %v2711_v36 = vld [vmem:[#allocation7 + $0xc] sm:$0xf] }
  0xef   :  { %v417_v46 = vrot.slane %v406_v38, %v2540_v3  ;;  %v421_v47 = vrot.slane %v407_v39, %v2540_v3  ;;  %v465_v48 = vrot.slane %v406_v38, %v2542_v4  ;;  %v469_v49 = vrot.slane %v407_v39, %v2542_v4 }
  0xf0   :  { %v425_v51 = vrot.slane %v408_v41, %v2540_v3  ;;  %v433_v52 = vrot.slane %v410_v42, %v2540_v3  ;;  %v445_v53 = vrot.slane %v413_v43, %v2540_v3  ;;  %v473_v54 = vrot.slane %v408_v41, %v2542_v4 }
  0xf1   :  { %v446_v55 = vmul.f32 %v417_v46, %v2672_v40  ;;  %v447_v56 = vmul.f32 %v421_v47, %v2672_v40  ;;  %v481_v57 = vrot.slane %v410_v42, %v2542_v4  ;;  %v493_v58 = vrot.slane %v413_v43, %v2542_v4 }
  0xf2   :  { %v448_v59 = vmul.f32 %v425_v51, %v2672_v40  ;;  %v450_v60 = vmul.f32 %v433_v52, %v2672_v40  ;;  %v453_v61 = vmul.f32 %v445_v53, %v2672_v40  ;;  %v494_v63 = vmul.f32 %v465_v48, %v2674_v44 }
  0xf3   :  { %v454_v0 = vadd.f32 %v446_v55, %v2680_v50  ;;  %v455_v2 = vadd.f32 %v447_v56, %v2680_v50  ;;  %v495_v5 = vmul.f32 %v469_v49, %v2674_v44  ;;  %v496_v6 = vmul.f32 %v473_v54, %v2674_v44 }
  0xf4   :  { %v456_v8 = vadd.f32 %v448_v59, %v2680_v50  ;;  %v458_v9 = vadd.f32 %v450_v60, %v2680_v50  ;;  %v461_v10 = vadd.f32 %v453_v61, %v2680_v50  ;;  %v498_v13 = vmul.f32 %v481_v57, %v2674_v44 }
  0xf5   :  { %v501_v17 = vmul.f32 %v493_v58, %v2674_v44  ;;  %v502_v18 = vadd.f32 %v494_v63, %v454_v0  ;;  %v503_v22 = vadd.f32 %v495_v5, %v455_v2  ;;  %v513_v23 = vrot.slane %v406_v38, %v2561_v12 }
  0xf6   :  { %v504_v24 = vadd.f32 %v496_v6, %v456_v8  ;;  %v506_v25 = vadd.f32 %v498_v13, %v458_v9  ;;  %v517_v28 = vrot.slane %v407_v39, %v2561_v12  ;;  %v521_v29 = vrot.slane %v408_v41, %v2561_v12 }
  0xf7   :  { %v509_v30 = vadd.f32 %v501_v17, %v461_v10  ;;  %v529_v32 = vrot.slane %v410_v42, %v2561_v12  ;;  %v541_v33 = vrot.slane %v413_v43, %v2561_v12  ;;  %v542_v34 = vmul.f32 %v513_v23, %v2698_v7 }
  0xf8   :  { %v543_v37 = vmul.f32 %v517_v28, %v2698_v7  ;;  %v544_v46 = vmul.f32 %v521_v29, %v2698_v7  ;;  %v561_v47 = vrot.slane %v406_v38, %v2618_v35  ;;  %v565_v48 = vrot.slane %v407_v39, %v2618_v35  ;;  %v623_v39 = vld [vmem:[#allocation11] sm:$0xf] }
  0xf9   :  { %v546_v49 = vmul.f32 %v529_v32, %v2698_v7  ;;  %v549_v51 = vmul.f32 %v541_v33, %v2698_v7  ;;  %v550_v52 = vadd.f32 %v542_v34, %v502_v18  ;;  %v569_v53 = vrot.slane %v408_v41, %v2618_v35 }
  0xfa   :  { %v551_v54 = vadd.f32 %v543_v37, %v503_v22  ;;  %v552_v55 = vadd.f32 %v544_v46, %v504_v24  ;;  %v577_v56 = vrot.slane %v410_v42, %v2618_v35  ;;  %v589_v57 = vrot.slane %v413_v43, %v2618_v35  ;;  %v682_v46 = vld [vmem:[%s3069_s10 + $0x10] sm:$0xff] }
  0xfb   :  { %v554_v58 = vadd.f32 %v546_v49, %v506_v25  ;;  %v557_v59 = vadd.f32 %v549_v51, %v509_v30  ;;  %v590_v60 = vmul.f32 %v561_v47, %v2711_v36  ;;  %v591_v38 = vmul.f32 %v565_v48, %v2711_v36  ;;  %v683_v47 = vld [vmem:[%s3069_s10 + $0x18] sm:$0xff]  ;;  %v1662_v49 = vld [vmem:[#allocation14] ss:$0 sm:$0xff] }
  0xfc   :  { %v592_v61 = vmul.f32 %v569_v53, %v2711_v36  ;;  %v594_v63 = vmul.f32 %v577_v56, %v2711_v36  ;;  %v597_v0 = vmul.f32 %v589_v57, %v2711_v36  ;;  %v639_v43 = vrot.slane %v623_v39, %v2540_v3 }
  0xfd   :  { %v598_v41 = vadd.f32 %v590_v60, %v550_v52  ;;  %v599_v2 = vadd.f32 %v591_v38, %v551_v54  ;;  %v2731_v10 = vrot.slane %v623_v39, %v2542_v4  ;;  %v2734_v13 = vrot.slane %v623_v39, %v2561_v12  ;;  %v782_v52 = vld [vmem:[#allocation2 + $0x8] sm:$0x3]  ;;  %v685_v38 = vld [vmem:[%s3071_s12] sm:$0xff] }
  0xfe   :  { %v600_v5 = vadd.f32 %v592_v61, %v552_v55  ;;  %v602_v6 = vadd.f32 %v594_v63, %v554_v58  ;;  %v605_v42 = vadd.f32 %v597_v0, %v557_v59  ;;  %v2740_v23 = vrot.slane %v623_v39, %v2618_v35  ;;  %v781_v55 = vld [vmem:[#allocation2] sm:$0xff]  ;;  %v686_v39 = vld [vmem:[%s3071_s12 + $0x8] sm:$0xff]  ;;  %v687_v63 = vld [vmem:[%s3071_s12 + $0x10] sm:$0xff] }
  0xff   :  { %v606_v8 = vadd.f32 %v598_v41, %v2559_v11  ;;  %v607_v9 = vadd.f32 %v599_v2, %v2568_v15  ;;  %v2267_v37 = vmov 0.0|0.0   ;;  %v1925_v48 = vpack.c.bf16 %v683_v47, %v682_v46  ;;  %v688_v0 = vld [vmem:[%s3071_s12 + $0x18] sm:$0xff]  ;;  %v690_v2 = vld [vmem:[%s3073_s14] sm:$0xff] }
 0x100   :  { %v608_v17 = vadd.f32 %v600_v5, %v2573_v16  ;;  %v610_v18 = vadd.f32 %v602_v6, %v2582_v19  ;;  %v613_v22 = vadd.f32 %v605_v42, %v2587_v20  ;;  %v680_v19 = vld [vmem:[%s3069_s10] sm:$0xff]  ;;  %v681_v20 = vld [vmem:[%s3069_s10 + $0x8] sm:$0xff]  ;;  %1921 = vmatprep.subr.bf16.mxu1 %v2267_v37  ;;  %v1927_v61 = vpack.c.bf16 %v686_v39, %v685_v38 }
 0x101   :  { %v614_v24 = vmax.f32 %v606_v8, 0.0  ;;  %v615_v25 = vmax.f32 %v607_v9, 0.0  ;;  %v1922_v34 = vpack.c.bf16 %v681_v20, %v680_v19  ;;  %v1931_v41 = vpack.c.bf16 %v688_v0, %v687_v63  ;;  %v691_v5 = vld [vmem:[%s3073_s14 + $0x8] sm:$0xff]  ;;  %v2796_v42 = vld [vmem:[%s3070_s11] ss:$0 sm:$0xff] }
 0x102   :  { %v616_v11 = vmax.f32 %v608_v17, 0.0  ;;  %v618_v28 = vmax.f32 %v610_v18, 0.0  ;;  %v621_v15 = vmax.f32 %v613_v22, 0.0  ;;  %1928 = vmatprep.subr.bf16.mxu0 %v1927_v61  ;;  %v1935_v6 = vpack.c.bf16 %v691_v5, %v690_v2  ;;  %v1673_v19 = vld [vmem:[#allocation16] ss:$0 sm:$0xff] }
 0x103   :  { %v640_v29 = vadd.f32 %v639_v43, %v614_v24  ;;  %v649_v30 = vadd.f32 %v2731_v10, %v615_v25  ;;  %1923 = vmatpush3.bf16.msra.mxu1 %v1922_v34  ;;  %1930 = vmatpush3.bf16.msra.mxu0 %v1927_v61  ;;  %v2862_v61 = vld [vmem:[%s3086_s26 + $0xc] sm:$0xf] }
 0x104   :  { %v643_v32 = vadd.f32 %v639_v43, %v618_v28  ;;  %v657_v33 = vadd.f32 %v2734_v13, %v616_v11  ;;  %v667_v16 = vadd.f32 %v2740_v23, %v621_v15  ;;  %1924 = vmatprep.subr.bf16.mxu1 %v2267_v37  ;;  %1932 = vmatprep.subr.bf16.mxu0 %v1931_v41  ;;  %v692_v15 = vld [vmem:[%s3073_s14 + $0x10] sm:$0xff] }
 0x105   :  { %642 = vst.msk [vmem:[#allocation2 + $0xb] sm:$0xf] %vm641_vm4, %v640_v29  ;;  %650 = vst.msk [vmem:[#allocation2 + $0x15] sm:$0xf] %vm641_vm4, %v649_v30  ;;  %v693_v29 = vld [vmem:[%s3073_s14 + $0x18] sm:$0xff] }
 0x106   :  { %668 = vst.msk [vmem:[#allocation2 + $0x2e] sm:$0xf] %vm641_vm4, %v667_v16  ;;  %644 = vst.msk [vmem:[#allocation2 + $0x10] sm:$0xf] %vm641_vm4, %v643_v32  ;;  %v1939_v30 = vpack.c.bf16 %v693_v29, %v692_v15  ;;  %v1679_v32 = vld [vmem:[%s3067_s8 + $0x20] sm:$0xff]  ;;  %v325_v29 = vrot.slane %v2862_v61, %v2561_v12 }
 0x107   :  { %658 = vst.msk [vmem:[#allocation2 + $0x1f] sm:$0xf] %vm641_vm4, %v657_v33  ;;  %1926 = vmatpush3.bf16.msra.mxu1 %v1925_v48  ;;  %1934 = vmatpush3.bf16.msra.mxu0 %v1931_v41  ;;  %v1680_v33 = vld [vmem:[%s3067_s8 + $0x28] sm:$0xff] }
 0x108   :  { %1951 = vmatprep.subr.bf16.mxu1 %v2267_v37  ;;  %1936 = vmatprep.subr.bf16.mxu0 %v1935_v6  ;;  %v1943_v16 = vpack.c.bf16 %v1680_v33, %v1679_v32 }
 0x1b2   :  { %v1788_v51 = vpop.f32.mrb[0].mxu0 }
 0x1b3   :  { %v778_v53 = vadd.f32 %v1788_v51, %v1662_v49  ;;  %v772_v54 = vpop.f32.mrb[1].mxu0  ;;  %v2835_v51 = vld [vmem:[%s3086_s26 + $0x14] sm:$0xf] }
 0x1b4   :  { %v773_v56 = vadd.f32 %v1662_v49, %v772_v54 }
 0x1b5   :  { %v784_v57 = vadd.f32 %v782_v52, %v778_v53  ;;  %v237_v52 = vrot.slane %v2835_v51, %v2540_v3  ;;  %v2845_v53 = vld [vmem:[%s3086_s26 + $0x18] sm:$0xf] }
 0x1b6   :  { %v783_v58 = vadd.f32 %v781_v55, %v773_v56  ;;  %v333_v56 = vrot.slane %v2835_v51, %v2561_v12  ;;  %v289_v39 = vrot.slane %v2845_v53, %v2542_v4  ;;  %v337_v2 = vrot.slane %v2845_v53, %v2561_v12 }
 0x1b7   :  { %786 = vst.msk [vmem:[#allocation2 + $0x8] sm:$0x3] %vm631_vm1, %v784_v57  ;;  %v241_v57 = vrot.slane %v2845_v53, %v2540_v3 }
 0x1b8   :  { %785 = vst.msk [vmem:[#allocation2] sm:$0xff] %vm624_vm0, %v783_v58  ;;  %v300_v5 = vmul.f32 %v289_v39, %v2603_v27 }
 0x1b9   :  { %v252_v38 = vmul.f32 %v241_v57, %v2589_v21 }
 0x1bb   :  { %v260_v41 = vadd.f32 %v252_v38, %v2612_v31 }
 0x1be   :  { %v788_v60 = vld [vmem:[#allocation2 + $0x8] sm:$0xff] }
 0x1bf   :  { %v787_v59 = vld [vmem:[#allocation2] sm:$0xff] }
 0x1c0   :  { %1798 = vmatmul.mubr.msk.f32.vlgmr.msra.gmra.mrb[0].mxu1 %vm624_vm0, %v787_v59 }
 0x1c1   :  { %1800 = vmatprep.mubr.msk.f32.mxu1 %vm2268_vm5, %v2266_v1 }
 0x1c4   :  { %1801 = vmatmul.mubr.msk.f32.gmra.mrb[2].mxu1 %vm624_vm0, %v788_v60 }
 0x1c5   :  { %1803 = vmatprep.mubr.msk.f32.mxu1 %vm2268_vm5, %v2266_v1 }
 0x293   :  { %v887_v43 = vpop.f32.mrb[0].mxu1 }
 0x294   :  { %v888_v8 = vadd.f32 %v2796_v42, %v887_v43  ;;  %v1799_v9 = vpop.f32.mrb[1].mxu1 }
 0x295   :  { %v385_v9 = vrot.slane %v2845_v53, %v2618_v35 }
 0x296   :  { %v921_v17 = vadd.f32 %v888_v8, %v787_v59  ;;  %v347_v59 = vmul.f32 %v333_v56, %v2629_v45  ;;  %v348_v8 = vmul.f32 %v337_v2, %v2629_v45  ;;  %v1682_v56 = vld [vmem:[%s3067_s8 + $0x38] sm:$0xff] }
 0x297   :  { %v892_v18 = vpop.f32.mrb[2].mxu1 }
 0x298   :  { %928 = vst.msk [vmem:[#allocation2] sm:$0xff] %vm624_vm0, %v921_v17  ;;  %v893_v22 = vadd.f32 %v2796_v42, %v892_v18  ;;  %v1802_v24 = vpop.f32.mrb[3].mxu1  ;;  %v277_v17 = vrot.slane %v2862_v61, %v2542_v4  ;;  %v308_v18 = vadd.f32 %v300_v5, %v260_v41 }
 0x29a   :  { %v922_v25 = vadd.f32 %v893_v22, %v788_v60  ;;  %v381_v60 = vrot.slane %v2835_v51, %v2618_v35  ;;  %v297_v15 = vmul.f32 %v277_v17, %v2603_v27 }
 0x29c   :  { %929 = vst.msk [vmem:[#allocation2 + $0x8] sm:$0xff] %vm624_vm0, %v922_v25  ;;  %v395_v0 = vmul.f32 %v381_v60, %v2651_v62  ;;  %v396_v25 = vmul.f32 %v385_v9, %v2651_v62 }
 0x29f   :  { %v2802_v11 = vld [vmem:[#allocation2] sm:$0xff] }
 0x2a0   :  { %1826 = vmatprep.mubr.msk.f32.mxu0 %vm624_vm0, %v2802_v11 }
 0x2a3   :  { %v2806_v28 = vld [vmem:[#allocation2 + $0x8] sm:$0x3] }
 0x2a4   :  { %1827 = vmatmul.mubr.msk.f32.vlgmr.msra.gmra.mrb[2].mxu0 %vm624_vm0, %v2806_v28 }
 0x2a5   :  { %1938 = vmatpush3.bf16.msra.mxu0 %v1935_v6  ;;  %v229_v6 = vrot.slane %v2862_v61, %v2540_v3 }
 0x2a6   :  { %1940 = vmatprep.subr.bf16.mxu0 %v1939_v30 }
 0x2a7   :  { %v249_v22 = vmul.f32 %v229_v6, %v2589_v21 }
 0x2a9   :  { %1942 = vmatpush3.bf16.msra.mxu0 %v1939_v30  ;;  %v356_v30 = vadd.f32 %v348_v8, %v308_v18  ;;  %v257_v32 = vadd.f32 %v249_v22, %v2612_v31 }
 0x2aa   :  { %1944 = vmatprep.subr.bf16.mxu0 %v1943_v16 }
 0x377   :  { %v1828_v20 = vpop.f32.mrb[2].mxu0 }
 0x378   :  { %v1021_v34 = vadd.f32 %v1828_v20, %v1673_v19  ;;  %v1015_v46 = vpop.f32.mrb[3].mxu0  ;;  %v404_v20 = vadd.f32 %v396_v25, %v356_v30 }
 0x379   :  { %v1016_v47 = vadd.f32 %v1673_v19, %v1015_v46  ;;  %v373_v19 = vrot.slane %v2862_v61, %v2618_v35 }
 0x37a   :  { %v2826_v49 = vadd.f32 %v1021_v34, %v2563_v14  ;;  %v285_v14 = vrot.slane %v2835_v51, %v2542_v4 }
 0x37b   :  { %v2823_v48 = vadd.f32 %v1016_v47, %v2601_v26  ;;  %v251_v26 = vmul.f32 %v237_v52, %v2589_v21  ;;  %v305_v21 = vadd.f32 %v297_v15, %v257_v32  ;;  %v412_v47 = vmax.f32 %v404_v20, 0.0 }
 0x37c   :  { %v299_v55 = vmul.f32 %v285_v14, %v2603_v27  ;;  %v393_v27 = vmul.f32 %v373_v19, %v2651_v62 }
 0x37d   :  { %1837 = vmatprep.mubr.msk.f32.mxu0 %vm624_vm0, %v2823_v48  ;;  %v259_v54 = vadd.f32 %v251_v26, %v2612_v31  ;;  %v537_v2 = vrot.slane %v412_v47, %v2561_v12  ;;  %v585_v9 = vrot.slane %v412_v47, %v2618_v35 }
 0x37e   :  { %1838 = vmatmul.mubr.msk.f32.vlgmr.msra.gmra.mrb[4].mxu0 %vm624_vm0, %v2826_v49 }
 0x37f   :  { %1946 = vmatpush3.bf16.msra.mxu0 %v1943_v16  ;;  %v307_v58 = vadd.f32 %v299_v55, %v259_v54  ;;  %v345_v16 = vmul.f32 %v325_v29, %v2629_v45  ;;  %v441_v45 = vrot.slane %v412_v47, %v2540_v3  ;;  %v1681_v55 = vld [vmem:[%s3067_s8 + $0x30] sm:$0xff]  ;;  %v548_v8 = vmul.f32 %v537_v2, %v2698_v7 }
 0x380   :  { %v1947_v60 = vpack.c.bf16 %v1682_v56, %v1681_v55  ;;  %v596_v25 = vmul.f32 %v585_v9, %v2711_v36  ;;  %v1685_v55 = vld [vmem:[%s3069_s10 + $0x30] sm:$0xff]  ;;  %v1686_v56 = vld [vmem:[%s3069_s10 + $0x38] sm:$0xff] }
 0x381   :  { %v355_v63 = vadd.f32 %v347_v59, %v307_v58  ;;  %v353_v52 = vadd.f32 %v345_v16, %v305_v21  ;;  %v489_v59 = vrot.slane %v412_v47, %v2542_v4  ;;  %v452_v38 = vmul.f32 %v441_v45, %v2672_v40 }
 0x382   :  { %1948 = vmatprep.subr.bf16.mxu0 %v1947_v60 }
 0x383   :  { %v403_v43 = vadd.f32 %v395_v0, %v355_v63  ;;  %v401_v54 = vadd.f32 %v393_v27, %v353_v52  ;;  %v500_v41 = vmul.f32 %v489_v59, %v2674_v44  ;;  %v460_v5 = vadd.f32 %v452_v38, %v2680_v50  ;;  %1950 = vmatpush3.bf16.msra.mxu0 %v1947_v60 }
 0x385   :  { %v411_v24 = vmax.f32 %v403_v43, 0.0  ;;  %v409_v39 = vmax.f32 %v401_v54, 0.0  ;;  %v508_v18 = vadd.f32 %v500_v41, %v460_v5 }
 0x387   :  { %v437_v33 = vrot.slane %v411_v24, %v2540_v3  ;;  %v485_v46 = vrot.slane %v411_v24, %v2542_v4  ;;  %v533_v14 = vrot.slane %v411_v24, %v2561_v12  ;;  %v581_v58 = vrot.slane %v411_v24, %v2618_v35 }
 0x388   :  { %v429_v6 = vrot.slane %v409_v39, %v2540_v3  ;;  %v477_v17 = vrot.slane %v409_v39, %v2542_v4  ;;  %v525_v29 = vrot.slane %v409_v39, %v2561_v12  ;;  %v789_v3 = vld [vmem:[#allocation2 + $0x10] sm:$0xff]  ;;  %v556_v30 = vadd.f32 %v548_v8, %v508_v18  ;;  %v1683_v4 = vld [vmem:[%s3069_s10 + $0x20] sm:$0xff] }
 0x389   :  { %v451_v34 = vmul.f32 %v437_v33, %v2672_v40  ;;  %v499_v31 = vmul.f32 %v485_v46, %v2674_v44  ;;  %v547_v57 = vmul.f32 %v533_v14, %v2698_v7  ;;  %v595_v0 = vmul.f32 %v581_v58, %v2711_v36  ;;  %1804 = vmatmul.mubr.msk.f32.gmra.mrb[4].mxu1 %vm624_vm0, %v789_v3 }
 0x38a   :  { %v449_v22 = vmul.f32 %v429_v6, %v2672_v40  ;;  %v497_v15 = vmul.f32 %v477_v17, %v2674_v44  ;;  %v573_v33 = vrot.slane %v409_v39, %v2618_v35  ;;  %v1684_v44 = vld [vmem:[%s3069_s10 + $0x28] sm:$0xff]  ;;  %1806 = vmatprep.mubr.msk.f32.mxu1 %vm2268_vm5, %v2266_v1  ;;  %v604_v12 = vadd.f32 %v596_v25, %v556_v30 }
 0x38b   :  { %v459_v26 = vadd.f32 %v451_v34, %v2680_v50  ;;  %v1952_v16 = vpack.c.bf16 %v1684_v44, %v1683_v4  ;;  %v1688_v44 = vld [vmem:[%s3071_s12 + $0x20] sm:$0xff] }
 0x38c   :  { %v457_v32 = vadd.f32 %v449_v22, %v2680_v50  ;;  %v593_v35 = vmul.f32 %v573_v33, %v2711_v36  ;;  %v612_v20 = vadd.f32 %v604_v12, %v2845_v53  ;;  %v1689_v12 = vld [vmem:[%s3071_s12 + $0x28] sm:$0xff] }
 0x38d   :  { %v507_v62 = vadd.f32 %v499_v31, %v459_v26  ;;  %1953 = vmatpush3.bf16.msra.mxu1 %v1952_v16  ;;  %v1691_v16 = vld [vmem:[%s3071_s12 + $0x38] sm:$0xff] }
 0x38e   :  { %v505_v50 = vadd.f32 %v497_v15, %v457_v32  ;;  %1954 = vmatprep.subr.bf16.mxu1 %v2267_v37 }
 0x38f   :  { %v555_v63 = vadd.f32 %v547_v57, %v507_v62  ;;  %v1955_v62 = vpack.c.bf16 %v1686_v56, %v1685_v55 }
 0x391   :  { %v603_v43 = vadd.f32 %v595_v0, %v555_v63  ;;  %1956 = vmatpush3.bf16.msra.mxu1 %v1955_v62 }
 0x393   :  { %v611_v24 = vadd.f32 %v603_v43, %v2835_v51  ;;  %v545_v51 = vmul.f32 %v525_v29, %v2698_v7  ;;  %v620_v7 = vmax.f32 %v612_v20, 0.0  ;;  %v1692_v20 = vld [vmem:[%s3073_s14 + $0x20] sm:$0xff] }
 0x395   :  { %v619_v40 = vmax.f32 %v611_v24, 0.0  ;;  %v553_v21 = vadd.f32 %v545_v51, %v505_v50  ;;  %v659_v46 = vadd.f32 %v2734_v13, %v620_v7  ;;  %v1696_v24 = vld [vmem:[#allocation14 + $0x1] ss:$0 sm:$0xff]  ;;  %v1957_v50 = vpack.c.bf16 %v1689_v12, %v1688_v44  ;;  %v1713_v44 = vld [vmem:[#allocation19] ss:$0 sm:$0xff] }
 0x397   :  { %v651_v19 = vadd.f32 %v2731_v10, %v619_v40  ;;  %v601_v34 = vadd.f32 %v593_v35, %v553_v21  ;;  %660 = vst.msk [vmem:[#allocation2 + $0x24] sm:$0xf] %vm641_vm4, %v659_v46  ;;  %1958 = vmatprep.subr.bf16.mxu0 %v1957_v50  ;;  %v1690_v35 = vld [vmem:[%s3071_s12 + $0x30] sm:$0xff]  ;;  %v1693_v21 = vld [vmem:[%s3073_s14 + $0x28] sm:$0xff] }
 0x398   :  { %v1965_v7 = vpack.c.bf16 %v1693_v21, %v1692_v20 }
 0x399   :  { %652 = vst.msk [vmem:[#allocation2 + $0x1a] sm:$0xf] %vm641_vm4, %v651_v19  ;;  %v609_v27 = vadd.f32 %v601_v34, %v2862_v61  ;;  %v1676_v61 = vld [vmem:[#allocation17] ss:$0 sm:$0xff]  ;;  %v1961_v19 = vpack.c.bf16 %v1691_v16, %v1690_v35  ;;  %v1699_v34 = vld [vmem:[%s3070_s11 + $0x1] ss:$0 sm:$0xff] }
 0x39b   :  { %v617_v36 = vmax.f32 %v609_v27, 0.0 }
 0x39d   :  { %v665_v10 = vadd.f32 %v2740_v23, %v617_v36  ;;  %v793_v23 = vld [vmem:[#allocation2 + $0x30] sm:$0x3] }
 0x39e   :  { %v791_v53 = vld [vmem:[#allocation2 + $0x20] sm:$0xff] }
 0x39f   :  { %666 = vst.msk [vmem:[#allocation2 + $0x29] sm:$0xf] %vm641_vm4, %v665_v10 }
 0x3a0   :  { %v790_v47 = vld [vmem:[#allocation2 + $0x18] sm:$0xff] }
 0x3a1   :  { %1807 = vmatmul.mubr.msk.f32.gmra.mrb[6].mxu1 %vm624_vm0, %v790_v47 }
 0x3a2   :  { %1809 = vmatprep.mubr.msk.f32.mxu1 %vm2268_vm5, %v2266_v1 }
 0x3a5   :  { %1810 = vmatmul.mubr.msk.f32.gmra.mrb[8].mxu1 %vm624_vm0, %v791_v53 }
 0x3a6   :  { %1812 = vmatprep.mubr.msk.f32.mxu1 %vm2268_vm5, %v2266_v1  ;;  %v792_v13 = vld [vmem:[#allocation2 + $0x28] sm:$0xff] }
 0x3a9   :  { %1813 = vmatmul.mubr.msk.f32.gmra.mrb[10].mxu1 %vm624_vm0, %v792_v13 }
 0x3aa   :  { %1815 = vmatprep.mubr.msk.f32.mxu1 %vm2268_vm5, %v2266_v1 }
 0x3ad   :  { %1816 = vmatmul.mubr.msk.f32.gmra.mrb[12].mxu1 %vm624_vm0, %v793_v23 }
 0x3ae   :  { %1859 = vmatprep.mubr.msk.f32.mxu1 %vm2268_vm5, %v2266_v1 }
 0x451   :  { %v1839_v52 = vpop.f32.mrb[4].mxu0 }
 0x452   :  { %v1110_v26 = vadd.f32 %v1839_v52, %v1676_v61  ;;  %v1104_v31 = vpop.f32.mrb[5].mxu0 }
 0x453   :  { %v1105_v14 = vadd.f32 %v1676_v61, %v1104_v31 }
 0x454   :  { %v2954_v54 = vadd.f32 %v1110_v26, %v2826_v49 }
 0x455   :  { %v2951_v45 = vadd.f32 %v1105_v14, %v2823_v48 }
 0x457   :  { %1848 = vmatprep.mubr.msk.f32.mxu0 %vm624_vm0, %v2951_v45 }
 0x458   :  { %1849 = vmatmul.mubr.msk.f32.vlgmr.msra.gmra.mrb[6].mxu0 %vm624_vm0, %v2954_v54 }
 0x459   :  { %1960 = vmatpush3.bf16.msra.mxu0 %v1957_v50 }
 0x45a   :  { %1962 = vmatprep.subr.bf16.mxu0 %v1961_v19 }
 0x45c   :  { %v897_v48 = vpop.f32.mrb[4].mxu1 }
 0x45d   :  { %v898_v57 = vadd.f32 %v2796_v42, %v897_v48  ;;  %v1805_v49 = vpop.f32.mrb[5].mxu1  ;;  %1964 = vmatpush3.bf16.msra.mxu0 %v1961_v19 }
 0x45e   :  { %1966 = vmatprep.subr.bf16.mxu0 %v1965_v7 }
 0x45f   :  { %v923_v58 = vadd.f32 %v898_v57, %v789_v3 }
 0x461   :  { %930 = vst.msk [vmem:[#allocation2 + $0x10] sm:$0xff] %vm624_vm0, %v923_v58 }
 0x468   :  { %v1236_v4 = vld [vmem:[#allocation2 + $0x10] sm:$0xff] }
 0x474   :  { %v902_v59 = vpop.f32.mrb[6].mxu1 }
 0x475   :  { %v903_v60 = vadd.f32 %v2796_v42, %v902_v59  ;;  %v1808_v38 = vpop.f32.mrb[7].mxu1 }
 0x477   :  { %v924_v39 = vadd.f32 %v903_v60, %v790_v47 }
 0x478   :  { %v907_v63 = vpop.f32.mrb[8].mxu1 }
 0x479   :  { %931 = vst.msk [vmem:[#allocation2 + $0x18] sm:$0xff] %vm624_vm0, %v924_v39  ;;  %v908_v0 = vadd.f32 %v2796_v42, %v907_v63  ;;  %v1811_v41 = vpop.f32.mrb[9].mxu1 }
 0x47b   :  { %v925_v2 = vadd.f32 %v908_v0, %v791_v53 }
 0x47c   :  { %v912_v5 = vpop.f32.mrb[10].mxu1 }
 0x47d   :  { %932 = vst.msk [vmem:[#allocation2 + $0x20] sm:$0xff] %vm624_vm0, %v925_v2  ;;  %v913_v6 = vadd.f32 %v2796_v42, %v912_v5  ;;  %v1814_v43 = vpop.f32.mrb[11].mxu1 }
 0x47e   :  { %v1694_v43 = vld [vmem:[%s3073_s14 + $0x30] sm:$0xff] }
 0x47f   :  { %v926_v8 = vadd.f32 %v913_v6, %v792_v13 }
 0x480   :  { %v917_v9 = vpop.f32.mrb[12].mxu1 }
 0x481   :  { %933 = vst.msk [vmem:[#allocation2 + $0x28] sm:$0xff] %vm624_vm0, %v926_v8  ;;  %v918_v17 = vadd.f32 %v2796_v42, %v917_v9  ;;  %v1817_v18 = vpop.f32.mrb[13].mxu1  ;;  %v1695_v8 = vld [vmem:[%s3073_s14 + $0x38] sm:$0xff] }
 0x482   :  { %v1969_v9 = vpack.c.bf16 %v1695_v8, %v1694_v43 }
 0x483   :  { %v927_v22 = vadd.f32 %v918_v17, %v793_v23  ;;  %v1707_v17 = vld [vmem:[#allocation16 + $0x1] ss:$0 sm:$0xff] }
 0x485   :  { %934 = vst.msk [vmem:[#allocation2 + $0x30] sm:$0x3] %vm631_vm1, %v927_v22 }
 0x488   :  { %v1239_v40 = vld [vmem:[#allocation2 + $0x28] sm:$0xff] }
 0x48c   :  { %v1240_v51 = vld [vmem:[#allocation2 + $0x30] sm:$0x3] }
 0x52b   :  { %v1850_v25 = vpop.f32.mrb[6].mxu0 }
 0x52c   :  { %v1227_v15 = vadd.f32 %v1850_v25, %v1696_v24  ;;  %v1221_v29 = vpop.f32.mrb[7].mxu0 }
 0x52d   :  { %v1222_v3 = vadd.f32 %v1696_v24, %v1221_v29 }
 0x52e   :  { %v1231_v30 = vadd.f32 %v1227_v15, %v2806_v28  ;;  %v1238_v28 = vld [vmem:[#allocation2 + $0x20] sm:$0xff] }
 0x52f   :  { %v1230_v32 = vadd.f32 %v1222_v3, %v2802_v11  ;;  %v1237_v11 = vld [vmem:[#allocation2 + $0x18] sm:$0xff]  ;;  %v1567_v3 = vld [vmem:[%s3075_s16] sm:$0xff] }
 0x530   :  { %1233 = vst.msk [vmem:[#allocation2 + $0x8] sm:$0x3] %vm631_vm1, %v1231_v30  ;;  %v1568_v30 = vld [vmem:[%s3075_s16 + $0x8] sm:$0xff] }
 0x531   :  { %1232 = vst.msk [vmem:[#allocation2] sm:$0xff] %vm624_vm0, %v1230_v32  ;;  %v1974_v32 = vpack.c.bf16 %v1568_v30, %v1567_v3 }
 0x537   :  { %v1235_v42 = vld [vmem:[#allocation2 + $0x8] sm:$0xff] }
 0x538   :  { %v1234_v33 = vld [vmem:[#allocation2] sm:$0xff] }
 0x539   :  { %1860 = vmatmul.mubr.msk.f32.vlgmr.msra.gmra.mrb[14].mxu1 %vm624_vm0, %v1234_v33 }
 0x53a   :  { %1862 = vmatprep.mubr.msk.f32.mxu1 %vm2268_vm5, %v2266_v1 }
 0x53d   :  { %1863 = vmatmul.mubr.msk.f32.gmra.mrb[16].mxu1 %vm624_vm0, %v1235_v42 }
 0x53e   :  { %1865 = vmatprep.mubr.msk.f32.mxu1 %vm2268_vm5, %v2266_v1 }
 0x541   :  { %1866 = vmatmul.mubr.msk.f32.gmra.mrb[18].mxu1 %vm624_vm0, %v1236_v4 }
 0x542   :  { %1868 = vmatprep.mubr.msk.f32.mxu1 %vm2268_vm5, %v2266_v1 }
 0x545   :  { %1869 = vmatmul.mubr.msk.f32.gmra.mrb[20].mxu1 %vm624_vm0, %v1237_v11 }
 0x546   :  { %1871 = vmatprep.mubr.msk.f32.mxu1 %vm2268_vm5, %v2266_v1 }
 0x549   :  { %1872 = vmatmul.mubr.msk.f32.gmra.mrb[22].mxu1 %vm624_vm0, %v1238_v28 }
 0x54a   :  { %1874 = vmatprep.mubr.msk.f32.mxu1 %vm2268_vm5, %v2266_v1 }
 0x54d   :  { %1875 = vmatmul.mubr.msk.f32.gmra.mrb[24].mxu1 %vm624_vm0, %v1239_v40 }
 0x54e   :  { %1877 = vmatprep.mubr.msk.f32.mxu1 %vm2268_vm5, %v2266_v1 }
 0x551   :  { %1878 = vmatmul.mubr.msk.f32.gmra.mrb[26].mxu1 %vm624_vm0, %v1240_v51 }
 0x60c   :  { %v1334_v46 = vpop.f32.mrb[14].mxu1 }
 0x60d   :  { %v1335_v27 = vadd.f32 %v1699_v34, %v1334_v46  ;;  %v1861_v36 = vpop.f32.mrb[15].mxu1 }
 0x60f   :  { %v1368_v47 = vadd.f32 %v1335_v27, %v1234_v33  ;;  %v1710_v33 = vld [vmem:[#allocation17 + $0x1] ss:$0 sm:$0xff] }
 0x610   :  { %v1339_v10 = vpop.f32.mrb[16].mxu1 }
 0x611   :  { %1375 = vst.msk [vmem:[#allocation2] sm:$0xff] %vm624_vm0, %v1368_v47  ;;  %v1340_v53 = vadd.f32 %v1699_v34, %v1339_v10  ;;  %v1864_v13 = vpop.f32.mrb[17].mxu1 }
 0x613   :  { %v1369_v23 = vadd.f32 %v1340_v53, %v1235_v42 }
 0x614   :  { %v1344_v61 = vpop.f32.mrb[18].mxu1 }
 0x615   :  { %1376 = vst.msk [vmem:[#allocation2 + $0x8] sm:$0xff] %vm624_vm0, %v1369_v23  ;;  %v1345_v52 = vadd.f32 %v1699_v34, %v1344_v61  ;;  %v1867_v26 = vpop.f32.mrb[19].mxu1 }
 0x617   :  { %v1370_v31 = vadd.f32 %v1345_v52, %v1236_v4 }
 0x618   :  { %v1349_v14 = vpop.f32.mrb[20].mxu1  ;;  %v1382_v55 = vld [vmem:[#allocation2] sm:$0xff] }
 0x619   :  { %1377 = vst.msk [vmem:[#allocation2 + $0x10] sm:$0xff] %vm624_vm0, %v1370_v31  ;;  %v1350_v56 = vadd.f32 %v1699_v34, %v1349_v14  ;;  %1888 = vmatprep.mubr.msk.f32.mxu0 %vm624_vm0, %v1382_v55  ;;  %v1870_v62 = vpop.f32.mrb[21].mxu1 }
 0x61b   :  { %v1371_v48 = vadd.f32 %v1350_v56, %v1237_v11 }
 0x61c   :  { %v1354_v57 = vpop.f32.mrb[22].mxu1  ;;  %v1383_v49 = vld [vmem:[#allocation2 + $0x8] sm:$0x3] }
 0x61d   :  { %1378 = vst.msk [vmem:[#allocation2 + $0x18] sm:$0xff] %vm624_vm0, %v1371_v48  ;;  %v1355_v58 = vadd.f32 %v1699_v34, %v1354_v57  ;;  %1889 = vmatmul.mubr.msk.f32.vlgmr.msra.gmra.mrb[8].mxu0 %vm624_vm0, %v1383_v49  ;;  %v1873_v59 = vpop.f32.mrb[23].mxu1 }
 0x61e   :  { %1968 = vmatpush3.bf16.msra.mxu0 %v1965_v7 }
 0x61f   :  { %v1372_v60 = vadd.f32 %v1355_v58, %v1238_v28  ;;  %1970 = vmatprep.subr.bf16.mxu0 %v1969_v9 }
 0x620   :  { %v1359_v38 = vpop.f32.mrb[24].mxu1 }
 0x621   :  { %1379 = vst.msk [vmem:[#allocation2 + $0x20] sm:$0xff] %vm624_vm0, %v1372_v60  ;;  %v1360_v39 = vadd.f32 %v1699_v34, %v1359_v38  ;;  %v1876_v63 = vpop.f32.mrb[25].mxu1 }
 0x622   :  { %1972 = vmatpush3.bf16.msra.mxu0 %v1969_v9 }
 0x623   :  { %v1373_v0 = vadd.f32 %v1360_v39, %v1239_v40  ;;  %1973 = vmatprep.subr.bf16.mxu0 %v2267_v37 }
 0x624   :  { %v1364_v41 = vpop.f32.mrb[26].mxu1 }
 0x625   :  { %1380 = vst.msk [vmem:[#allocation2 + $0x28] sm:$0xff] %vm624_vm0, %v1373_v0  ;;  %v1365_v2 = vadd.f32 %v1699_v34, %v1364_v41  ;;  %v1879_v5 = vpop.f32.mrb[27].mxu1 }
 0x627   :  { %v1374_v6 = vadd.f32 %v1365_v2, %v1240_v51 }
 0x629   :  { %1381 = vst.msk [vmem:[#allocation2 + $0x30] sm:$0x3] %vm631_vm1, %v1374_v6 }
 0x6f0   :  { %v1890_v18 = vpop.f32.mrb[8].mxu0 }
 0x6f1   :  { %v1468_v22 = vadd.f32 %v1890_v18, %v1707_v17  ;;  %v1462_v24 = vpop.f32.mrb[9].mxu0 }
 0x6f2   :  { %v1463_v25 = vadd.f32 %v1707_v17, %v1462_v24 }
 0x6f3   :  { %v1472_v29 = vadd.f32 %v1468_v22, %v2954_v54 }
 0x6f4   :  { %v1471_v15 = vadd.f32 %v1463_v25, %v2951_v45  ;;  %v1569_v45 = vld [vmem:[%s3075_s16 + $0x10] sm:$0xff] }
 0x6f6   :  { %1899 = vmatprep.mubr.msk.f32.mxu0 %vm624_vm0, %v1471_v15 }
 0x6f7   :  { %1900 = vmatmul.mubr.msk.f32.vlgmr.msra.gmra.mrb[10].mxu0 %vm624_vm0, %v1472_v29 }
 0x6f8   :  { %1910 = vmatprep.mubr.msk.f32.mxu0 %vm2268_vm5, %v2266_v1  ;;  %1975 = vmatpush3.bf16.msra.mxu0 %v1974_v32  ;;  %v1570_v1 = vld [vmem:[%s3075_s16 + $0x18] sm:$0xff] }
 0x6f9   :  { %1976 = vmatprep.subr.bf16.mxu0 %v2267_v37  ;;  %v1977_v54 = vpack.c.bf16 %v1570_v1, %v1569_v45 }
 0x6fc   :  { %1978 = vmatpush3.bf16.msra.mxu0 %v1977_v54 }
 0x7ca   :  { %v1901_v42 = vpop.f32.mrb[10].mxu0 }
 0x7cb   :  { %v1551_v4 = vpop.f32.mrb[11].mxu0 }
 0x7cc   :  { %v1552_v11 = vadd.f32 %v1710_v33, %v1551_v4 }
 0x7ce   :  { %v1559_v28 = vadd.f32 %v1552_v11, %v1471_v15 }
 0x7d0   :  { %v1561_v40 = vrot.slane %v1559_v28, 4 }
 0x7d2   :  { %v1564_v51 = vsel %vm1563_vm6, %v1559_v28, %v1561_v40 }
 0x7d3   :  { %v1566_v37 = vsel %vm1565_vm7, %v1564_v51, 0.0 }
 0x7d4   :  { %1911 = vmatmul.mubr.msk.f32.vlgmr.msra.gmra.mrb[12].mxu0 %vm624_vm0, %v1566_v37 }
 0x8a7   :  { %v1647_v12 = vpop.f32.mrb[12].mxu0 }
 0x8a8   :  { %v1648_v50 = vadd.f32 %v1713_v44, %v1647_v12  ;;  %v1912_v35 = vpop.f32.mrb[13].mxu0 }
 0x8aa   :  { %1651 = vst [vmem:[%s3077_s18] sm:$0xff] %v1648_v50 }
 0x8ab   :  { %1656 = vsyncpa [#allocation4], 1 }
 0x8ac   :  { %1657 = vsyncpa [#allocation6], 1 }
 0x8ad   :  { %1658 = vsyncpa [#allocation9], 1 }
 0x8ae   :  { %1659 = vsyncpa [#allocation12], 1 }
 0x8af   :  { %1660 = vsyncpa [#allocation15], 1 }
 0x8b0   :  { %1661 = vsyncpa [#allocation18], 1 }

</bundles_post_ra>
